<compile_context>
chip_gen: v6e
topology: v6e:2x2x1
jax: 0.10.0
libtpu: 0.0.40
codegen_flags: <defaults>
</compile_context>

<pallas_src>
import jax
import jax.numpy as jnp
from jax.experimental import pallas as pl
from jax.experimental.pallas import tpu as pltpu


def _din_attention_kernel(t_ref, h_ref, mask_ref,
                          wt_ref, whp_ref, b1_ref, w2_ref, b2_ref,
                          out_ref):
    t_bf = t_ref[...]                       # (TB, D)      bf16
    h_bf = h_ref[...]                       # (TB, Lp, D)  bf16
    mask = mask_ref[...]                    # (TB, Lp)     f32
    TB, L, D = h_bf.shape
    Hp = b1_ref.shape[-1]

    # Target-only term of the folded Linear(4D->H); bias fused once at
    # (TB, Hp) instead of per (TB, L, Hp) row.
    zb = jnp.dot(t_bf, wt_ref[...],
                 preferred_element_type=jnp.float32) + b1_ref[...]       # (TB, Hp)

    # Fused K=2D matmul: [h | t*h] @ [[W1h - W1d], [W1p]]  (single MXU pass).
    p_bf = t_bf[:, None, :] * h_bf                                       # (TB, Lp, D) bf16 VPU
    hp = jnp.concatenate([h_bf, p_bf], axis=-1).reshape(TB * L, 2 * D)   # (TB*Lp, 2D) bf16
    z_hl = jnp.dot(hp, whp_ref[...],
                   preferred_element_type=jnp.float32)                   # (TB*Lp, Hp) f32

    z1 = jnp.maximum(z_hl.reshape(TB, L, Hp) + zb[:, None, :], 0.0)      # ReLU

    # Linear(Hp -> 1): VPU multiply + lane reduce (padded W2 columns are 0).
    w = jnp.sum(z1 * w2_ref[...], axis=-1) + b2_ref[0]                   # (TB, Lp)
    w = w * mask                                                         # use_softmax=False path

    # Weighted sum over the sequence: VPU multiply + sublane reduce
    # (no M=1 MXU contraction — strictly worse on TPU).
    out = jnp.sum(w[:, :, None] * h_bf, axis=1)                          # (TB, D) f32
    out_ref[...] = out.astype(out_ref.dtype)


def _round_up(x, m):
    return ((x + m - 1) // m) * m


def din_attention(target, history, mask, w1, b1, w2, b2, *,
                  max_batch_block=512,
                  vmem_working_budget_bytes=24 * 1024 * 1024,
                  vmem_limit_bytes=44 * 1024 * 1024):
    """target (B,D), history (B,L,D), mask (B,L) or None;
       w1 (4D,H), b1 (H,), w2 (H,1), b2 (1,)."""
    B, L, D = history.shape
    H = b1.shape[0]
    assert target.shape == (B, D)
    assert w1.shape == (4 * D, H) and w2.shape == (H, 1) and b2.shape == (1,)
    if mask is None:
        mask = jnp.ones((B, L), jnp.float32)

    # ---- weight prep (once, in the wrapper) ------------------------------
    Hp = _round_up(H, 128)                                   # lane-dense hidden dim
    w1t, w1h, w1d, w1p = w1[:D], w1[D:2 * D], w1[2 * D:3 * D], w1[3 * D:]
    pad_h = lambda m: jnp.pad(m, ((0, 0), (0, Hp - H)))
    wt = pad_h(w1t + w1d).astype(jnp.bfloat16)                          # (D, Hp)
    whp = pad_h(jnp.concatenate([w1h - w1d, w1p], axis=0)
                ).astype(jnp.bfloat16)                                  # (2D, Hp) stacked
    b1p = pad_h(b1.reshape(1, H)).astype(jnp.float32)                   # (1, Hp)
    w2p = pad_h(w2.reshape(1, H)).astype(jnp.float32)                   # (1, Hp)
    b2v = b2.astype(jnp.float32).reshape(1)                             # (1,) SMEM scalar

    # ---- input padding + batch tiling ------------------------------------
    # L padded to a multiple of 16 (bf16 sublane packing; keeps the
    # (TB,L,D) -> (TB*L,2D) reshape a free layout view).
    Lp = _round_up(L, 16)

    # Double-buffer-aware per-batch-row working-set estimate (bytes):
    # 2x bf16 history buffers + bf16 t*h + bf16 [h|t*h] + two f32 (Lp,Hp)
    # intermediates + f32 weighted-sum temp + mask.
    per_row = Lp * (14 * D + 12 * Hp + 16)
    tb_cap = max(16, min(max_batch_block,
                         (vmem_working_budget_bytes // max(per_row, 1)) // 16 * 16))

    Bp_min = _round_up(B, 16)
    n_steps = max(1, -(-Bp_min // tb_cap))                   # ceil division
    if n_steps == 1 and Bp_min >= 32:
        n_steps = 2                                          # keep both v7x TCs busy
    tb = _round_up(-(-Bp_min // n_steps), 16)                # multiple of 16, never 1
    Bp = n_steps * tb                                        # pad B, no divisor search

    t_p = jnp.pad(target.astype(jnp.bfloat16), ((0, Bp - B), (0, 0)))
    h_p = jnp.pad(history.astype(jnp.bfloat16), ((0, Bp - B), (0, Lp - L), (0, 0)))
    m_p = jnp.pad(mask.astype(jnp.float32), ((0, Bp - B), (0, Lp - L)))

    wspec = lambda shape: pl.BlockSpec(shape, lambda i: (0, 0))  # VMEM-resident weights

    out = pl.pallas_call(
        _din_attention_kernel,
        out_shape=jax.ShapeDtypeStruct((Bp, D), jnp.float32),
        grid=(n_steps,),
        in_specs=[
            pl.BlockSpec((tb, D), lambda i: (i, 0)),            # target   (bf16)
            pl.BlockSpec((tb, Lp, D), lambda i: (i, 0, 0)),     # history  (bf16)
            pl.BlockSpec((tb, Lp), lambda i: (i, 0)),           # mask     (f32)
            wspec((D, Hp)),                                     # W1t + W1d
            wspec((2 * D, Hp)),                                 # [W1h - W1d ; W1p]
            wspec((1, Hp)),                                     # b1
            wspec((1, Hp)),                                     # W2 (as a row)
            pl.BlockSpec(memory_space=pltpu.MemorySpace.SMEM),  # b2 scalar
        ],
        out_specs=pl.BlockSpec((tb, D), lambda i: (i, 0)),
        compiler_params=pltpu.CompilerParams(
            dimension_semantics=("parallel",),
            vmem_limit_bytes=vmem_limit_bytes),
    )(t_p, h_p, m_p, wt, whp, b1p, w2p, b2v)
    return out[:B]


def din_attention_ref(target, history, mask, w1, b1, w2, b2):
    B, L, D = history.shape
    t_exp = jnp.broadcast_to(target[:, None, :], (B, L, D))
    att_in = jnp.concatenate([t_exp, history, t_exp - history, t_exp * history], axis=-1)
    z1 = jnp.maximum(att_in.reshape(-1, 4 * D) @ w1 + b1, 0.0)
    w = (z1 @ w2 + b2).reshape(B, L)
    w = w * mask
    return jnp.sum(w[:, :, None] * history, axis=1)


if __name__ == "__main__":
    # small shapes consistent with the module: embedding_dim=64, attention_units=[32]
    B, L, D, H = 4, 8, 64, 32

    key = jax.random.PRNGKey(0)
    k_t, k_h, k_m, k_w1, k_b1, k_w2, k_b2 = jax.random.split(key, 7)

    target = jax.random.normal(k_t, (B, D), dtype=jnp.float32)
    history = jax.random.normal(k_h, (B, L, D), dtype=jnp.float32)
    mask = (jax.random.uniform(k_m, (B, L)) > 0.3).astype(jnp.float32)

    # deterministic synthetic MLP params (Linear(4D->H), Linear(H->1))
    w1 = jax.random.normal(k_w1, (4 * D, H), dtype=jnp.float32) * (1.0 / jnp.sqrt(4 * D))
    b1 = jax.random.normal(k_b1, (H,), dtype=jnp.float32) * 0.01
    w2 = jax.random.normal(k_w2, (H, 1), dtype=jnp.float32) * (1.0 / jnp.sqrt(H))
    b2 = jax.random.normal(k_b2, (1,), dtype=jnp.float32) * 0.01

    out = din_attention(target, history, mask, w1, b1, w2, b2)
    out = jax.block_until_ready(out)

    ref = din_attention_ref(target, history, mask, w1, b1, w2, b2)
    assert out.shape == (B, D)
    assert jnp.allclose(out, ref, rtol=5e-2, atol=5e-2), "mismatch vs JAX reference"

    print("KERNEL_OK")
</pallas_src>

<mosaic_0001>
module attributes {stable_mosaic.version = 11 : i64} {
  func.func @_din_attention_kernel(%arg0: i32, %arg1: memref<16x64xbf16, #tpu.memory_space<vmem>>, %arg2: memref<16x16x64xbf16, #tpu.memory_space<vmem>>, %arg3: memref<16x16xf32, #tpu.memory_space<vmem>>, %arg4: memref<64x128xbf16, #tpu.memory_space<vmem>>, %arg5: memref<128x128xbf16, #tpu.memory_space<vmem>>, %arg6: memref<1x128xf32, #tpu.memory_space<vmem>>, %arg7: memref<1x128xf32, #tpu.memory_space<vmem>>, %arg8: memref<1xf32, #tpu.memory_space<smem>>, %arg9: memref<16x64xf32, #tpu.memory_space<vmem>>) attributes {dimension_semantics = [#tpu.dimension_semantics<parallel>], iteration_bounds = array<i64: 1>, scalar_prefetch = 0 : i64, scratch_operands = 0 : i64, tpu.core_type = #tpu.core_type<tc>, window_params = [{transform_indices = @transform_0, window_bounds = array<i64: 16, 64>}, {transform_indices = @transform_1, window_bounds = array<i64: 16, 16, 64>}, {transform_indices = @transform_2, window_bounds = array<i64: 16, 16>}, {pipeline_mode = #tpu.pipeline_mode<synchronous>, transform_indices = @transform_3, window_bounds = array<i64: 64, 128>}, {pipeline_mode = #tpu.pipeline_mode<synchronous>, transform_indices = @transform_4, window_bounds = array<i64: 128, 128>}, {pipeline_mode = #tpu.pipeline_mode<synchronous>, transform_indices = @transform_5, window_bounds = array<i64: 1, 128>}, {pipeline_mode = #tpu.pipeline_mode<synchronous>, transform_indices = @transform_6, window_bounds = array<i64: 1, 128>}, {transform_indices = @transform_7, window_bounds = array<i64: 1>}, {transform_indices = @transform_8, window_bounds = array<i64: 16, 64>}]} {
    %c0 = arith.constant 0 : index
    %c0_0 = arith.constant 0 : index
    %0 = vector.load %arg1[%c0, %c0_0] : memref<16x64xbf16, #tpu.memory_space<vmem>>, vector<16x64xbf16>
    %c0_1 = arith.constant 0 : index
    %c0_2 = arith.constant 0 : index
    %c0_3 = arith.constant 0 : index
    %1 = vector.load %arg2[%c0_1, %c0_2, %c0_3] : memref<16x16x64xbf16, #tpu.memory_space<vmem>>, vector<16x16x64xbf16>
    %c0_4 = arith.constant 0 : index
    %c0_5 = arith.constant 0 : index
    %2 = vector.load %arg3[%c0_4, %c0_5] : memref<16x16xf32, #tpu.memory_space<vmem>>, vector<16x16xf32>
    %c0_6 = arith.constant 0 : index
    %c0_7 = arith.constant 0 : index
    %3 = vector.load %arg4[%c0_6, %c0_7] : memref<64x128xbf16, #tpu.memory_space<vmem>>, vector<64x128xbf16>
    %cst = arith.constant dense<0.000000e+00> : vector<16x128xf32>
    %4 = tpu.matmul %0, %3, %cst {dimension_numbers = #tpu.dot_dimension_numbers<[1], [0], [0], [1], [0, 0, 1, 1], [], []>} : vector<16x64xbf16>, vector<64x128xbf16>, vector<16x128xf32> -> vector<16x128xf32>
    %c0_8 = arith.constant 0 : index
    %c0_9 = arith.constant 0 : index
    %5 = vector.load %arg6[%c0_8, %c0_9] : memref<1x128xf32, #tpu.memory_space<vmem>>, vector<1x128xf32>
    %6 = vector.broadcast %5 : vector<1x128xf32> to vector<16x128xf32>
    %7 = arith.addf %4, %6 : vector<16x128xf32>
    %8 = vector.shape_cast %0 : vector<16x64xbf16> to vector<16x1x64xbf16>
    %9 = vector.broadcast %8 : vector<16x1x64xbf16> to vector<16x16x64xbf16>
    %10 = arith.mulf %9, %1 : vector<16x16x64xbf16>
    %11 = tpu.concatenate %1, %10 in 2 : vector<16x16x64xbf16>, vector<16x16x64xbf16> -> vector<16x16x128xbf16>
    %12 = vector.shape_cast %11 : vector<16x16x128xbf16> to vector<256x128xbf16>
    %c0_10 = arith.constant 0 : index
    %c0_11 = arith.constant 0 : index
    %13 = vector.load %arg5[%c0_10, %c0_11] : memref<128x128xbf16, #tpu.memory_space<vmem>>, vector<128x128xbf16>
    %cst_12 = arith.constant dense<0.000000e+00> : vector<256x128xf32>
    %14 = tpu.matmul %12, %13, %cst_12 {dimension_numbers = #tpu.dot_dimension_numbers<[1], [0], [0], [1], [0, 0, 1, 1], [], []>} : vector<256x128xbf16>, vector<128x128xbf16>, vector<256x128xf32> -> vector<256x128xf32>
    %15 = vector.shape_cast %14 : vector<256x128xf32> to vector<16x16x128xf32>
    %16 = vector.shape_cast %7 : vector<16x128xf32> to vector<16x1x128xf32>
    %17 = vector.broadcast %16 : vector<16x1x128xf32> to vector<16x16x128xf32>
    %18 = arith.addf %15, %17 : vector<16x16x128xf32>
    %cst_13 = arith.constant 0.000000e+00 : f32
    %19 = vector.broadcast %cst_13 : f32 to vector<16x16x128xf32>
    %20 = arith.maximumf %18, %19 : vector<16x16x128xf32>
    %c0_14 = arith.constant 0 : index
    %c0_15 = arith.constant 0 : index
    %21 = vector.load %arg7[%c0_14, %c0_15] : memref<1x128xf32, #tpu.memory_space<vmem>>, vector<1x128xf32>
    %22 = vector.shape_cast %21 : vector<1x128xf32> to vector<1x1x128xf32>
    %23 = vector.broadcast %22 : vector<1x1x128xf32> to vector<16x16x128xf32>
    %24 = arith.mulf %20, %23 : vector<16x16x128xf32>
    %cst_16 = arith.constant dense<0.000000e+00> : vector<16x16xf32>
    %25 = vector.multi_reduction <add>, %24, %cst_16 [2] : vector<16x16x128xf32> to vector<16x16xf32>
    %c0_17 = arith.constant 0 : index
    %26 = memref.load %arg8[%c0_17] : memref<1xf32, #tpu.memory_space<smem>>
    %27 = vector.broadcast %26 : f32 to vector<16x16xf32>
    %28 = arith.addf %25, %27 : vector<16x16xf32>
    %29 = arith.mulf %28, %2 : vector<16x16xf32>
    %30 = vector.shape_cast %29 : vector<16x16xf32> to vector<16x16x1xf32>
    %31 = arith.extf %1 : vector<16x16x64xbf16> to vector<16x16x64xf32>
    %32 = vector.broadcast %30 : vector<16x16x1xf32> to vector<16x16x64xf32>
    %33 = arith.mulf %32, %31 : vector<16x16x64xf32>
    %cst_18 = arith.constant dense<0.000000e+00> : vector<16x64xf32>
    %34 = vector.multi_reduction <add>, %33, %cst_18 [1] : vector<16x16x64xf32> to vector<16x64xf32>
    %c0_19 = arith.constant 0 : index
    %c0_20 = arith.constant 0 : index
    %35 = vector.load %arg9[%c0_19, %c0_20] : memref<16x64xf32, #tpu.memory_space<vmem>>, vector<16x64xf32>
    tpu.vector_store %arg9[%c0_19, %c0_20], %34 {strides = array<i32>} : memref<16x64xf32, #tpu.memory_space<vmem>>, vector<16x64xf32>,
    return
  }
  func.func @transform_0(%arg0: i32) -> (i32, i32) {
    %c0_i32 = arith.constant 0 : i32
    %c0_i32_0 = arith.constant 0 : i32
    return %arg0, %c0_i32 : i32, i32
  }
  func.func @transform_1(%arg0: i32) -> (i32, i32, i32) {
    %c0_i32 = arith.constant 0 : i32
    %c0_i32_0 = arith.constant 0 : i32
    %c0_i32_1 = arith.constant 0 : i32
    return %arg0, %c0_i32, %c0_i32_0 : i32, i32, i32
  }
  func.func @transform_2(%arg0: i32) -> (i32, i32) {
    %c0_i32 = arith.constant 0 : i32
    %c0_i32_0 = arith.constant 0 : i32
    return %arg0, %c0_i32 : i32, i32
  }
  func.func @transform_3(%arg0: i32) -> (i32, i32) {
    %c0_i32 = arith.constant 0 : i32
    %c0_i32_0 = arith.constant 0 : i32
    %c0_i32_1 = arith.constant 0 : i32
    return %c0_i32, %c0_i32_0 : i32, i32
  }
  func.func @transform_4(%arg0: i32) -> (i32, i32) {
    %c0_i32 = arith.constant 0 : i32
    %c0_i32_0 = arith.constant 0 : i32
    %c0_i32_1 = arith.constant 0 : i32
    return %c0_i32, %c0_i32_0 : i32, i32
  }
  func.func @transform_5(%arg0: i32) -> (i32, i32) {
    %c0_i32 = arith.constant 0 : i32
    %c0_i32_0 = arith.constant 0 : i32
    %c0_i32_1 = arith.constant 0 : i32
    return %c0_i32, %c0_i32_0 : i32, i32
  }
  func.func @transform_6(%arg0: i32) -> (i32, i32) {
    %c0_i32 = arith.constant 0 : i32
    %c0_i32_0 = arith.constant 0 : i32
    %c0_i32_1 = arith.constant 0 : i32
    return %c0_i32, %c0_i32_0 : i32, i32
  }
  func.func @transform_7(%arg0: i32) -> i32 {
    %c0_i32 = arith.constant 0 : i32
    %c0_i32_0 = arith.constant 0 : i32
    return %c0_i32 : i32
  }
  func.func @transform_8(%arg0: i32) -> (i32, i32) {
    %c0_i32 = arith.constant 0 : i32
    %c0_i32_0 = arith.constant 0 : i32
    return %arg0, %c0_i32 : i32, i32
  }
}

</mosaic_0001>

<bundles_post_ra>
// kernel: tpu_custom_call.1
= control target key start
LH: loop header
LB: loop body
LE: loop exit
PB: predicated region body
PF: predicated region fallthrough
CT: control target
= control target key end

     0   :  { %14 = vsyncpa [#allocation4], 0  ;;  %s2969_s0 = inlined_call_operand.hbm [shape: bf16[16,64], index: 0, kind: input, shape index: {}]   ;;  %s2970_s1 = inlined_call_operand.hbm [shape: bf16[16,16,64], index: 1, kind: input, shape index: {}]   ;;  %s2971_s2 = inlined_call_operand.hbm [shape: f32[16,16], index: 2, kind: input, shape index: {}]   ;;  %s2972_s3 = inlined_call_operand.hbm [shape: bf16[64,128], index: 3, kind: input, shape index: {}]   ;;  %s2973_s4 = inlined_call_operand.hbm [shape: bf16[128,128], index: 4, kind: input, shape index: {}]   ;;  %s2974_s5 = inlined_call_operand.vmem [shape: f32[1,128], index: 5, kind: input, shape index: {}]   ;;  %s2975_s6 = inlined_call_operand.vmem [shape: f32[1,128], index: 6, kind: input, shape index: {}]   ;;  %s2976_s7 = inlined_call_operand.<no memory space> [shape: f32[1], index: 7, kind: input, shape index: {}]   ;;  %s2977_s8 = inlined_call_operand.hbm [shape: f32[16,64], index: 8, kind: output, shape index: {}]  }
   0x1   :  { %15 = vsyncpa [#allocation7], 0 }
   0x2   :  { %16 = vsyncpa [#allocation10], 0 }
   0x3   :  { %17 = vsyncpa [#allocation5], 0  ;;  %s2331_s27 = smov [#allocation6]   ;;  %s2332_s29 = smov [#allocation9]  }
   0x4   :  { %s35_s28 = sshll.u32 %s2331_s27, 4  ;;  %s59_s30 = sshll.u32 %s2332_s29, 4  ;;  %s36_s28 = int_to_ptr.vmem [resolvable:$true] %s35_s28  ;;  %s60_s30 = int_to_ptr.vmem [resolvable:$true] %s59_s30 }
   0x5   :  { %s2211_s9 = scalar_lea.vmem %s36_s28, 2048  ;;  %p2216_p1 = scmp.lt.s32.totalorder %s36_s28, %s36_s28 }
   0x6   :  { %p2212_p0 = scmp.ne.s32.totalorder %s36_s28, %s2211_s9  ;;  %p2217_p2 = scmp.lt.s32.totalorder %s2211_s9, %s2211_s9 }
   0x8   :  { %p2218_p3 = por %p2217_p2, %p2216_p1 }
   0xa   :  { %p2219_p4 = pnand %p2218_p3, %p2212_p0 }
   0xc   :  { %2222 = shalt.err (!%p2219_p4)
}
   0xd   :  { %s2333_s10 = smov 64   ;;  %s2334_s11 = smov 4  }
   0xe   :  { %41 = dma.hbm_to_vmem [thread:$0]  %s2970_s1, 2048, %s36_s28, [#allocation7], %s2333_s10, %s2333_s10, %s2334_s11  }
   0xf   :  { %s2231_s14 = scalar_lea.vmem %s60_s30, 512  ;;  %p2236_p6 = scmp.lt.s32.totalorder %s60_s30, %s60_s30 }
  0x10   :  { %p2232_p5 = scmp.ne.s32.totalorder %s60_s30, %s2231_s14  ;;  %p2237_p7 = scmp.lt.s32.totalorder %s2231_s14, %s2231_s14 }
  0x12   :  { %p2238_p8 = por %p2237_p7, %p2236_p6 }
  0x14   :  { %p2239_p9 = pnand %p2238_p8, %p2232_p5 }
  0x16   :  { %2242 = shalt.err (!%p2239_p9)
}
  0x17   :  { %65 = dma.hbm_to_vmem [thread:$0]  %s2972_s3, 512, %s60_s30, [#allocation10], %s2333_s10, %s2333_s10, %s2334_s11  }
  0x18   :  { %s2335_s17 = smov [#allocation3]   ;;  %s2336_s19 = smov [#allocation8]  }
  0x19   :  { %s23_s18 = sshll.u32 %s2335_s17, 4  ;;  %s47_s20 = sshll.u32 %s2336_s19, 4  ;;  %s24_s18 = int_to_ptr.vmem [resolvable:$true] %s23_s18  ;;  %s48_s20 = int_to_ptr.vmem [resolvable:$true] %s47_s20 }
  0x1a   :  { %s2251_s1 = scalar_lea.vmem %s24_s18, 128  ;;  %p2256_p11 = scmp.lt.s32.totalorder %s24_s18, %s24_s18 }
  0x1b   :  { %p2252_p10 = scmp.ne.s32.totalorder %s24_s18, %s2251_s1  ;;  %p2257_p12 = scmp.lt.s32.totalorder %s2251_s1, %s2251_s1 }
  0x1d   :  { %p2258_p13 = por %p2257_p12, %p2256_p11 }
  0x1f   :  { %p2259_p0 = pnand %p2258_p13, %p2252_p10 }
  0x21   :  { %2262 = shalt.err (!%p2259_p0)
}
  0x22   :  { %29 = dma.hbm_to_vmem [thread:$0]  %s2969_s0, 128, %s24_s18, [#allocation4], %s2333_s10, %s2333_s10, %s2334_s11  }
  0x23   :  { %s2271_s3 = scalar_lea.vmem %s48_s20, 256  ;;  %p2276_p2 = scmp.lt.s32.totalorder %s48_s20, %s48_s20 }
  0x24   :  { %p2272_p1 = scmp.ne.s32.totalorder %s48_s20, %s2271_s3  ;;  %p2277_p3 = scmp.lt.s32.totalorder %s2271_s3, %s2271_s3 }
  0x26   :  { %p2278_p4 = por %p2277_p3, %p2276_p2 }
  0x28   :  { %p2279_p5 = pnand %p2278_p4, %p2272_p1 }
  0x2a   :  { %2282 = shalt.err (!%p2279_p5)
}
  0x2b   :  { %s2337_s23 = smov 128   ;;  %s2338_s24 = smov 8  }
  0x2c   :  { %53 = dma.hbm_to_vmem [thread:$0]  %s2971_s2, 256, %s48_s20, [#allocation7], %s2337_s23, %s2337_s23, %s2338_s24  }
  0x2d   :  { %s2339_s27 = smov [#allocation11]  }
  0x2e   :  { %s71_s28 = sshll.u32 %s2339_s27, 4  ;;  %s72_s28 = int_to_ptr.vmem [resolvable:$true] %s71_s28 }
  0x2f   :  { %s2291_s0 = scalar_lea.vmem %s72_s28, 1024  ;;  %p2296_p7 = scmp.lt.s32.totalorder %s72_s28, %s72_s28 }
  0x30   :  { %p2292_p6 = scmp.ne.s32.totalorder %s72_s28, %s2291_s0  ;;  %p2297_p8 = scmp.lt.s32.totalorder %s2291_s0, %s2291_s0 }
  0x32   :  { %p2298_p9 = por %p2297_p8, %p2296_p7 }
  0x34   :  { %p2299_p10 = pnand %p2298_p9, %p2292_p6 }
  0x36   :  { %2302 = shalt.err (!%p2299_p10)
}
  0x37   :  { %77 = dma.hbm_to_vmem [thread:$0]  %s2973_s4, 1024, %s72_s28, [#allocation10], %s2333_s10, %s2333_s10, %s2334_s11  }
  0x38   :  { %2323 = dma.done.wait [#allocation4], 128  }
  0x39   :  { %2324 = vsyncadd [#allocation4], 4294967168 }
  0x3a   :  { %2325 = dma.done.wait [#allocation7], 2304  }
  0x3b   :  { %2326 = vsyncadd [#allocation7], 4294964992 }
  0x3c   :  { %2327 = dma.done.wait [#allocation10], 1536  }
  0x3d   :  { %2328 = vsyncadd [#allocation10], 4294965760  ;;  %v228_v0 = vlaneseq  ;;  %v2340_v1 = vmov 1966171168   ;;  %v2341_v3 = vmov 0.0   ;;  %vm2342_vm0 = vmmov 0  }
  0x3e   :  { %v226_v2 = vunpack.c.l.s4 %v2340_v1  ;;  %2050 = vmatprep.subr.bf16.mxu0 %v2341_v3  ;;  %2058 = vmatprep.mubr.msk.bf16.mxu0 %vm2342_vm0, %v2341_v3  ;;  %v2427_v7 = vld [vmem:[#allocation3] sm:$0xf]  ;;  %v2429_v8 = vld [vmem:[#allocation3 + $0x4] sm:$0xf]  ;;  %v2444_v15 = vld [vmem:[#allocation6 + $0x30] sm:$0xff]   ;;  %vm180_vm1 = vcmask 523264  }
  0x3f   :  { %v2422_v4 = vshrl.u32 %v228_v0, 7  ;;  %v2449_v18 = vld [vmem:[#allocation6 + $0x40] sm:$0xff]   ;;  %v2453_v20 = vld [vmem:[#allocation6 + $0x48] sm:$0xff]   ;;  %v2466_v34 = vld [vmem:[#allocation6 + $0x38] sm:$0xff]   ;;  %vm1937_vm2 = vcmask 1041409   ;;  %vm1939_vm3 = vcmask 1042434  }
  0x40   :  { %v227_v5 = vunpack.c.0.s8 %v226_v2  ;;  %v2158_v25 = vld [vmem:[#allocation9 + $0x18] sm:$0xff]   ;;  %v2159_v31 = vld [vmem:[#allocation9 + $0x10] sm:$0xff]   ;;  %v2160_v51 = vld [vmem:[#allocation9 + $0x8] sm:$0xff]   ;;  %vm1941_vm4 = vcmask 1043459   ;;  %vm1943_vm5 = vcmask 1044484   ;;  %vm1945_vm6 = vcmask 1045509  }
  0x41   :  { %v2436_v12 = vsub.s32 0, %v2422_v4  ;;  %2051 = vmatpush3.bf16.msra.mxu0 %v2158_v25  ;;  %v2474_v41 = vld [vmem:[#allocation11 + $0x38] sm:$0xff]   ;;  %v2478_v46 = vld [vmem:[#allocation6] sm:$0xff]   ;;  %v2488_v56 = vld [vmem:[#allocation6 + $0x58] sm:$0xff]   ;;  %vm1947_vm7 = vcmask 1046534   ;;  %vm1949_vm8 = vcmask 1047559  }
  0x42   :  { %v2425_v6 = vsub.s32 %v227_v5, %v2422_v4  ;;  %2052 = vmatprep.subr.bf16.mxu0 %v2341_v3  ;;  %v2480_v47 = vld [vmem:[#allocation6 + $0x8] sm:$0xff]   ;;  %2110 = vmatprep.subr.bf16.mxu1 %v2474_v41  ;;  %v2494_v60 = vld [vmem:[#allocation11 + $0x30] sm:$0xff]   ;;  %v2499_v0 = vld [vmem:[#allocation6 + $0x50] sm:$0xff]  }
  0x43   :  { %v2161_v5 = vld [vmem:[#allocation9] sm:$0xff]   ;;  %2118 = vmatpush3.bf16.msra.mxu1 %v2474_v41 }
  0x44   :  { %v231_v9 = vrot.slane %v2427_v7, %v2425_v6  ;;  %v255_v10 = vrot.slane %v2429_v8, %v2425_v6  ;;  %2111 = vmatprep.subr.bf16.mxu1 %v2494_v60 }
  0x45   :  { %2053 = vmatpush3.bf16.msra.mxu0 %v2159_v31 }
  0x46   :  { %v232_v11 = vcombine.high %v231_v9, %v231_v9  ;;  %v2439_v13 = vrot.slane %v255_v10, %v2425_v6  ;;  %v2442_v14 = vrot.slane %v231_v9, %v2425_v6  ;;  %v256_v16 = vcombine.high %v255_v10, %v255_v10  ;;  %2054 = vmatprep.subr.bf16.mxu0 %v2341_v3 }
  0x47   :  { %v1982_v9 = vcombine.low %v2427_v7, %v2429_v8  ;;  %2119 = vmatpush3.bf16.msra.mxu1 %v2494_v60 }
  0x48   :  { %v2447_v17 = vrot.slane %v232_v11, %v2425_v6  ;;  %v1992_v19 = vpack.i.b16 %v2439_v13, %v2439_v13  ;;  %v282_v21 = vunpack.i.h.s16 %v2439_v13  ;;  %v1988_v22 = vpack.i.b16 %v2442_v14, %v2442_v14 }
  0x49   :  { %v274_v23 = vunpack.i.h.s16 %v2442_v14  ;;  %v2460_v24 = vrot.slane %v256_v16, %v2425_v6  ;;  %2055 = vmatpush3.bf16.msra.mxu0 %v2160_v51 }
  0x4a   :  { %v248_v26 = vcombine.high %v2447_v17, %v2447_v17  ;;  %v340_v27 = vrot.slane %v1992_v19, %v2436_v12  ;;  %v298_v28 = vpack.i.b16 %v282_v21, %v282_v21  ;;  %v308_v37 = vrot.slane %v1988_v22, %v2436_v12  ;;  %v2508_v19 = vld [vmem:[#allocation6 + $0x18] sm:$0xff]   ;;  %2056 = vmatprep.subr.bf16.mxu0 %v2341_v3 }
  0x4b   :  { %v290_v29 = vpack.i.b16 %v274_v23, %v274_v23  ;;  %v284_v30 = vunpack.i.h.s16 %v2460_v24  ;;  %v1993_v39 = vpack.i.b16 %v2460_v24, %v2460_v24  ;;  %v1989_v50 = vpack.i.b16 %v2447_v17, %v2447_v17  ;;  %v2516_v23 = vld [vmem:[#allocation11 + $0x28] sm:$0xff]  }
  0x4c   :  { %v1991_v32 = vpack.i.b16 %v248_v26, %v248_v26  ;;  %v426_v33 = vpack.i.b16 %v340_v27, %v340_v27  ;;  %v280_v35 = vunpack.i.h.s16 %v248_v26  ;;  %v344_v36 = vrot.slane %v298_v28, %v2436_v12  ;;  %2112 = vmatprep.subr.bf16.mxu1 %v2516_v23 }
  0x4d   :  { %v312_v38 = vrot.slane %v290_v29, %v2436_v12  ;;  %v300_v40 = vpack.i.b16 %v284_v30, %v284_v30  ;;  %v370_v57 = vpack.i.b16 %v308_v37, %v308_v37  ;;  %v348_v59 = vrot.slane %v1993_v39, %v2436_v12  ;;  %2057 = vmatpush3.bf16.msra.mxu0 %v2161_v5 }
  0x4e   :  { %v332_v42 = vrot.slane %v1991_v32, %v2436_v12  ;;  %v431_v43 = vrot.slane %v426_v33, %v2436_v12  ;;  %v296_v44 = vpack.i.b16 %v280_v35, %v280_v35  ;;  %v433_v45 = vpack.i.b16 %v344_v36, %v344_v36  ;;  %2062 = vmatprep.subr.bf16.mxu0 %v2474_v41 }
  0x4f   :  { %v377_v48 = vpack.i.b16 %v312_v38, %v312_v38  ;;  %v352_v49 = vrot.slane %v300_v40, %v2436_v12  ;;  %v276_v2 = vunpack.i.h.s16 %v2447_v17  ;;  %v316_v16 = vrot.slane %v1989_v50, %v2436_v12  ;;  %v2536_v40 = vld [vmem:[#allocation6 + $0x10] sm:$0xff]   ;;  %2120 = vmatpush3.bf16.msra.mxu1 %v2516_v23 }
  0x50   :  { %v412_v52 = vpack.i.b16 %v332_v42, %v332_v42  ;;  %v585_v53 = vmul.bf16 %v431_v43, %v2449_v18  ;;  %v336_v54 = vrot.slane %v296_v44, %v2436_v12  ;;  %v438_v55 = vrot.slane %v433_v45, %v2436_v12  ;;  %v2540_v44 = vld [vmem:[#allocation6 + $0x68] sm:$0xff]   ;;  %2059 = vmatmul.mubr.msk.bf16.vlgmr.msra.gmra.mxu0 %vm180_vm1, %v1982_v9 }
  0x51   :  { %v382_v58 = vrot.slane %v377_v48, %v2436_v12  ;;  %v447_v1 = vpack.i.b16 %v352_v49, %v352_v49  ;;  %v271_v21 = vcombine.high %v2439_v13, %v2439_v13  ;;  %v375_v17 = vrot.slane %v370_v57, %v2436_v12  ;;  %2063 = vmatpush3.bf16.msra.mxu0 %v2474_v41 }
  0x52   :  { %v417_v61 = vrot.slane %v412_v52, %v2436_v12  ;;  %625 = vrot.lane.b32.xlu1 %v585_v53, %s2333_s10  ;;  %v419_v62 = vpack.i.b16 %v336_v54, %v336_v54  ;;  %v586_v63 = vmul.bf16 %v438_v55, %v2453_v20  ;;  %v440_v7 = vpack.i.b16 %v348_v59, %v348_v59  ;;  %v2167_v52 = vld [vmem:[#allocation11 + $0x18] sm:$0xff]   ;;  %v2546_v53 = vld [vmem:[#allocation6 + $0x60] sm:$0xff]  }
  0x53   :  { %v578_v22 = vmul.bf16 %v382_v58, %v2480_v47  ;;  %v292_v8 = vpack.i.b16 %v276_v2, %v276_v2  ;;  %v452_v13 = vrot.slane %v447_v1, %v2436_v12  ;;  %v1994_v26 = vpack.i.b16 %v271_v21, %v271_v21  ;;  %2064 = vmatprep.subr.bf16.mxu0 %v2494_v60  ;;  %v2168_v1 = vld [vmem:[#allocation11 + $0x10] sm:$0xff]  }
  0x54   :  { %v583_v10 = vmul.bf16 %v417_v61, %v2444_v15  ;;  %v424_v11 = vrot.slane %v419_v62, %v2436_v12  ;;  %v286_v3 = vunpack.i.h.s16 %v271_v21  ;;  %v247_v28 = vcombine.high %v2442_v14, %v2442_v14  ;;  %v2166_v14 = vld [vmem:[#allocation11 + $0x20] sm:$0xff]   ;;  %v2556_v61 = vld [vmem:[#allocation6 + $0x28] sm:$0xff]  }
  0x55   :  { %v320_v27 = vrot.slane %v292_v8, %v2436_v12  ;;  %v384_v29 = vpack.i.b16 %v316_v16, %v316_v16  ;;  %v356_v30 = vrot.slane %v1994_v26, %v2436_v12  ;;  %v272_v32 = vcombine.high %v2460_v24, %v2460_v24  ;;  %2113 = vmatprep.subr.bf16.mxu1 %v2166_v14  ;;  %v2567_v16 = vld [vmem:[#allocation6 + $0x20] sm:$0xff]  }
  0x56   :  { %621 = vrot.lane.b32.xlu0 %v583_v10, %s2333_s10  ;;  %v584_v25 = vmul.bf16 %v424_v11, %v2466_v34  ;;  %627 = vrot.lane.b32.xlu1 %v586_v63, %s2333_s10  ;;  %v302_v31 = vpack.i.b16 %v286_v3, %v286_v3  ;;  %v577_v33 = vmul.bf16 %v375_v17, %v2478_v46  ;;  %v278_v37 = vunpack.i.h.s16 %v247_v28  ;;  %v2570_v17 = vld [vmem:[#allocation6 + $0x78] sm:$0xff]   ;;  %v2579_v3 = vld [vmem:[#allocation6 + $0x70] sm:$0xff]  }
  0x57   :  { %v391_v35 = vpack.i.b16 %v320_v27, %v320_v27  ;;  %v1990_v36 = vpack.i.b16 %v247_v28, %v247_v28  ;;  %v445_v38 = vrot.slane %v440_v7, %v2436_v12  ;;  %v588_v39 = vmul.bf16 %v452_v13, %v2488_v56  ;;  %2121 = vmatpush3.bf16.msra.mxu1 %v2166_v14 }
  0x58   :  { %v360_v24 = vrot.slane %v302_v31, %v2436_v12  ;;  %v288_v42 = vunpack.i.h.s16 %v272_v32  ;;  %v294_v45 = vpack.i.b16 %v278_v37, %v278_v37  ;;  %v389_v48 = vrot.slane %v384_v29, %v2436_v12  ;;  %2065 = vmatpush3.bf16.msra.mxu0 %v2494_v60  ;;  %2114 = vmatprep.subr.bf16.mxu1 %v2167_v52  ;;  %v134_v31 = vld [vmem:[#allocation8] sm:$0xff] }
  0x59   :  { %v396_v43 = vrot.slane %v391_v35, %v2436_v12  ;;  %v454_v49 = vpack.i.b16 %v356_v30, %v356_v30  ;;  %v324_v54 = vrot.slane %v1990_v36, %v2436_v12  ;;  %v1995_v57 = vpack.i.b16 %v272_v32, %v272_v32  ;;  %2066 = vmatprep.subr.bf16.mxu0 %v2516_v23 }
  0x5a   :  { %623 = vrot.lane.b32.xlu0 %v584_v25, %s2333_s10  ;;  %611 = vrot.lane.b32.xlu1 %v578_v22, %s2333_s10  ;;  %v461_v50 = vpack.i.b16 %v360_v24, %v360_v24  ;;  %v304_v51 = vpack.i.b16 %v288_v42, %v288_v42  ;;  %v328_v55 = vrot.slane %v294_v45, %v2436_v12  ;;  %v2169_v22 = vld [vmem:[#allocation11 + $0x8] sm:$0xff]   ;;  %v1326_v32 = vsub.s32 1, %v2422_v4 }
  0x5b   :  { %v587_v58 = vmul.bf16 %v445_v38, %v2499_v0  ;;  %v580_v59 = vmul.bf16 %v396_v43, %v2508_v19  ;;  %v579_v2 = vmul.bf16 %v389_v48, %v2536_v40  ;;  %v459_v5 = vrot.slane %v454_v49, %v2436_v12  ;;  %2122 = vmatpush3.bf16.msra.mxu1 %v2167_v52 }
  0x5c   :  { %v466_v41 = vrot.slane %v461_v50, %v2436_v12  ;;  %v405_v62 = vpack.i.b16 %v328_v55, %v328_v55  ;;  %v368_v63 = vrot.slane %v304_v51, %v2436_v12  ;;  %v398_v9 = vpack.i.b16 %v324_v54, %v324_v54  ;;  %2067 = vmatpush3.bf16.msra.mxu0 %v2516_v23  ;;  %v2170_v23 = vld [vmem:[#allocation11] sm:$0xff]   ;;  %v135_v51 = vld [vmem:[#allocation8 + $0x8] sm:$0xff] }
  0x5d   :  { %v364_v10 = vrot.slane %v1995_v57, %v2436_v12  ;;  %2115 = vmatprep.subr.bf16.mxu1 %v2168_v1  ;;  %v589_v7 = vmul.bf16 %v459_v5, %v2546_v53  ;;  %2068 = vmatprep.subr.bf16.mxu0 %v2166_v14  ;;  %v1327_v35 = vrot.slane %v134_v31, %v1326_v32  ;;  %v1337_v36 = vsub.s32 2, %v2422_v4 }
  0x5e   :  { %609 = vrot.lane.b32.xlu0 %v577_v33, %s2333_s10  ;;  %631 = vrot.lane.b32.xlu1 %v588_v39, %s2333_s10  ;;  %v590_v11 = vmul.bf16 %v466_v41, %v2540_v44  ;;  %v410_v60 = vrot.slane %v405_v62, %v2436_v12  ;;  %v475_v21 = vpack.i.b16 %v368_v63, %v368_v63  ;;  %v1359_v39 = vsub.s32 4, %v2422_v4 }
  0x5f   :  { %v468_v8 = vpack.i.b16 %v364_v10, %v364_v10  ;;  %v403_v25 = vrot.slane %v398_v9, %v2436_v12  ;;  %2123 = vmatpush3.bf16.msra.mxu1 %v2168_v1  ;;  %v1316_v33 = vrot.slane %v134_v31, %v2436_v12  ;;  %v1338_v37 = vrot.slane %v134_v31, %v1337_v36 }
  0x60   :  { %v582_v13 = vmul.bf16 %v410_v60, %v2556_v61  ;;  %v480_v26 = vrot.slane %v475_v21, %v2436_v12  ;;  %2069 = vmatpush3.bf16.msra.mxu0 %v2166_v14  ;;  %2116 = vmatprep.subr.bf16.mxu1 %v2169_v22  ;;  %v1348_v14 = vsub.s32 3, %v2422_v4  ;;  %v1360_v24 = vrot.slane %v134_v31, %v1359_v39 }
  0x61   :  { %2070 = vmatprep.subr.bf16.mxu0 %v2167_v52  ;;  %v581_v27 = vmul.bf16 %v403_v25, %v2567_v16  ;;  %v473_v28 = vrot.slane %v468_v8, %v2436_v12  ;;  %v1370_v42 = vsub.s32 5, %v2422_v4  ;;  %v1381_v45 = vsub.s32 6, %v2422_v4 }
  0x62   :  { %629 = vrot.lane.b32.xlu0 %v587_v58, %s2333_s10  ;;  %615 = vrot.lane.b32.xlu1 %v580_v59, %s2333_s10  ;;  %v592_v29 = vmul.bf16 %v480_v26, %v2570_v17  ;;  %v1349_v38 = vrot.slane %v134_v31, %v1348_v14  ;;  %v1392_v49 = vsub.s32 7, %v2422_v4  ;;  %v1415_v54 = vrot.slane %v135_v51, %v1326_v32 }
  0x63   :  { %2124 = vmatpush3.bf16.msra.mxu1 %v2169_v22  ;;  %v591_v30 = vmul.bf16 %v473_v28, %v2579_v3  ;;  %v1371_v43 = vrot.slane %v134_v31, %v1370_v42  ;;  %v1382_v48 = vrot.slane %v134_v31, %v1381_v45  ;;  %v1426_v55 = vrot.slane %v135_v51, %v1337_v36 }
  0x64   :  { %2071 = vmatpush3.bf16.msra.mxu0 %v2167_v52  ;;  %2117 = vmatprep.subr.bf16.mxu1 %v2170_v23  ;;  %v1393_v50 = vrot.slane %v134_v31, %v1392_v49  ;;  %v1404_v52 = vrot.slane %v135_v51, %v2436_v12  ;;  %v1437_v57 = vrot.slane %v135_v51, %v1348_v14 }
  0x65   :  { %2072 = vmatprep.subr.bf16.mxu0 %v2168_v1  ;;  %v1448_v4 = vrot.slane %v135_v51, %v1359_v39  ;;  %v1459_v58 = vrot.slane %v135_v51, %v1370_v42  ;;  %v1470_v59 = vrot.slane %v135_v51, %v1381_v45  ;;  %v1481_v41 = vrot.slane %v135_v51, %v1392_v49  ;;  %v2649_v49 = vld [vmem:[%s2975_s6] ss:$0 sm:$0xff] }
  0x66   :  { %613 = vrot.lane.b32.xlu0 %v579_v2, %s2333_s10  ;;  %635 = vrot.lane.b32.xlu1 %v590_v11, %s2333_s10 }
  0x67   :  { %2125 = vmatpush3.bf16.msra.mxu1 %v2170_v23 }
  0x68   :  { %2073 = vmatpush3.bf16.msra.mxu0 %v2168_v1 }
  0x69   :  { %2074 = vmatprep.subr.bf16.mxu0 %v2169_v22 }
  0x6a   :  { %633 = vrot.lane.b32.xlu0 %v589_v7, %s2333_s10  ;;  %619 = vrot.lane.b32.xlu1 %v582_v13, %s2333_s10 }
  0x6c   :  { %2075 = vmatpush3.bf16.msra.mxu0 %v2169_v22 }
  0x6d   :  { %2076 = vmatprep.subr.bf16.mxu0 %v2170_v23 }
  0x6e   :  { %617 = vrot.lane.b32.xlu0 %v581_v27, %s2333_s10  ;;  %639 = vrot.lane.b32.xlu1 %v592_v29, %s2333_s10 }
  0x70   :  { %2077 = vmatpush3.bf16.msra.mxu0 %v2170_v23 }
  0x72   :  { %637 = vrot.lane.b32.xlu0 %v591_v30, %s2333_s10  ;;  %1318 = vbcast.lane.b32.xlu1 %v1316_v33, 256 }
  0x76   :  { %1329 = vbcast.lane.b32.xlu1 %v1327_v35, 256  ;;  %1322 = vbcast.lane.b32.xlu0 %v1316_v33, 264  ;;  %v1981_v33 = vld [vmem:[%s2974_s5] ss:$0 sm:$0xff] }
  0x7a   :  { %1333 = vbcast.lane.b32.xlu1 %v1327_v35, 264  ;;  %1340 = vbcast.lane.b32.xlu0 %v1338_v37, 256 }
  0x7e   :  { %1344 = vbcast.lane.b32.xlu1 %v1338_v37, 264  ;;  %1351 = vbcast.lane.b32.xlu0 %v1349_v38, 256 }
  0x82   :  { %1355 = vbcast.lane.b32.xlu1 %v1349_v38, 264  ;;  %1362 = vbcast.lane.b32.xlu0 %v1360_v24, 256 }
  0x86   :  { %1366 = vbcast.lane.b32.xlu1 %v1360_v24, 264  ;;  %1373 = vbcast.lane.b32.xlu0 %v1371_v43, 256 }
  0x8a   :  { %1377 = vbcast.lane.b32.xlu1 %v1371_v43, 264  ;;  %1384 = vbcast.lane.b32.xlu0 %v1382_v48, 256 }
  0x8e   :  { %1388 = vbcast.lane.b32.xlu1 %v1382_v48, 264  ;;  %1395 = vbcast.lane.b32.xlu0 %v1393_v50, 256 }
  0x92   :  { %1399 = vbcast.lane.b32.xlu1 %v1393_v50, 264  ;;  %1406 = vbcast.lane.b32.xlu0 %v1404_v52, 256 }
  0x96   :  { %1410 = vbcast.lane.b32.xlu1 %v1404_v52, 264  ;;  %1417 = vbcast.lane.b32.xlu0 %v1415_v54, 256 }
  0x9a   :  { %1421 = vbcast.lane.b32.xlu1 %v1415_v54, 264  ;;  %1428 = vbcast.lane.b32.xlu0 %v1426_v55, 256 }
  0x9e   :  { %1432 = vbcast.lane.b32.xlu1 %v1426_v55, 264  ;;  %1439 = vbcast.lane.b32.xlu0 %v1437_v57, 256 }
  0xa2   :  { %1443 = vbcast.lane.b32.xlu1 %v1437_v57, 264  ;;  %1450 = vbcast.lane.b32.xlu0 %v1448_v4, 256 }
  0xa6   :  { %1454 = vbcast.lane.b32.xlu1 %v1448_v4, 264  ;;  %1461 = vbcast.lane.b32.xlu0 %v1459_v58, 256 }
  0xaa   :  { %1465 = vbcast.lane.b32.xlu1 %v1459_v58, 264  ;;  %1472 = vbcast.lane.b32.xlu0 %v1470_v59, 256 }
  0xae   :  { %1476 = vbcast.lane.b32.xlu1 %v1470_v59, 264  ;;  %1483 = vbcast.lane.b32.xlu0 %v1481_v41, 256 }
  0xb2   :  { %1487 = vbcast.lane.b32.xlu1 %v1481_v41, 264 }
  0xc4   :  { %v626_v62 = vpop.permute.xlu1 %625 }
  0xc5   :  { %v675_v11 = vsel %vm180_vm1, %v2449_v18, %v626_v62 }
  0xc8   :  { %v622_v63 = vpop.permute.xlu0 %621  ;;  %v628_v1 = vpop.permute.xlu1 %627 }
  0xc9   :  { %v667_v2 = vsel %vm180_vm1, %v2444_v15, %v622_v63 }
  0xca   :  { %2090 = vmatprep.mubr.bf16.mxu1 %v667_v2 }
  0xcc   :  { %v624_v5 = vpop.permute.xlu0 %623  ;;  %v612_v9 = vpop.permute.xlu1 %611 }
  0xcd   :  { %v671_v10 = vsel %vm180_vm1, %v2466_v34, %v624_v5  ;;  %v647_v21 = vsel %vm180_vm1, %v2480_v47, %v612_v9  ;;  %v679_v34 = vsel %vm180_vm1, %v2453_v20, %v628_v1 }
  0xce   :  { %2091 = vmatmul.mubr.bf16.vlgmr.msra.gmra.mxu1 %v671_v10 }
  0xcf   :  { %2094 = vmatprep.mubr.bf16.mxu1 %v675_v11 }
  0xd0   :  { %v610_v60 = vpop.permute.xlu0 %609  ;;  %v632_v22 = vpop.permute.xlu1 %631 }
  0xd1   :  { %v643_v7 = vsel %vm180_vm1, %v2478_v46, %v610_v60  ;;  %v687_v26 = vsel %vm180_vm1, %v2488_v56, %v632_v22 }
  0xd2   :  { %2078 = vmatprep.mubr.bf16.mxu0 %v643_v7 }
  0xd3   :  { %2079 = vmatmul.mubr.bf16.vlgmr.msra.gmra.mxu0 %v647_v21 }
  0xd4   :  { %v630_v15 = vpop.permute.xlu0 %629  ;;  %v616_v8 = vpop.permute.xlu1 %615 }
  0xd5   :  { %v683_v25 = vsel %vm180_vm1, %v2499_v0, %v630_v15  ;;  %v655_v47 = vsel %vm180_vm1, %v2508_v19, %v616_v8 }
  0xd6   :  { %2095 = vmatmul.mubr.bf16.gmra.mxu1 %v679_v34 }
  0xd7   :  { %2098 = vmatprep.mubr.bf16.mxu1 %v683_v25 }
  0xd8   :  { %v614_v18 = vpop.permute.xlu0 %613  ;;  %v636_v13 = vpop.permute.xlu1 %635 }
  0xd9   :  { %v651_v46 = vsel %vm180_vm1, %v2536_v40, %v614_v18  ;;  %v695_v40 = vsel %vm180_vm1, %v2540_v44, %v636_v13 }
  0xda   :  { %2082 = vmatprep.mubr.bf16.mxu0 %v651_v46 }
  0xdb   :  { %2083 = vmatmul.mubr.bf16.gmra.mxu0 %v655_v47 }
  0xdc   :  { %v634_v23 = vpop.permute.xlu0 %633  ;;  %v620_v20 = vpop.permute.xlu1 %619 }
  0xdd   :  { %v691_v0 = vsel %vm180_vm1, %v2546_v53, %v634_v23  ;;  %v663_v19 = vsel %vm180_vm1, %v2556_v61, %v620_v20 }
  0xde   :  { %2099 = vmatmul.mubr.bf16.gmra.mxu1 %v687_v26 }
  0xdf   :  { %2102 = vmatprep.mubr.bf16.mxu1 %v691_v0 }
  0xe0   :  { %v618_v27 = vpop.permute.xlu0 %617  ;;  %v640_v53 = vpop.permute.xlu1 %639 }
  0xe1   :  { %v659_v28 = vsel %vm180_vm1, %v2567_v16, %v618_v27  ;;  %v703_v30 = vsel %vm180_vm1, %v2570_v17, %v640_v53 }
  0xe2   :  { %2086 = vmatprep.mubr.bf16.mxu0 %v659_v28 }
  0xe3   :  { %2087 = vmatmul.mubr.bf16.gmra.mxu0 %v663_v19 }
  0xe4   :  { %v638_v56 = vpop.permute.xlu0 %637 }
  0xe5   :  { %v699_v29 = vsel %vm180_vm1, %v2579_v3, %v638_v56 }
  0xe6   :  { %2103 = vmatmul.mubr.bf16.gmra.mxu1 %v695_v40 }
  0xe7   :  { %2106 = vmatprep.mubr.bf16.mxu1 %v699_v29 }
  0xee   :  { %2107 = vmatmul.mubr.bf16.gmra.mxu1 %v703_v30 }
 0x110   :  { %v218_v61 = vpop.f32.mrf.mxu0 }
 0x111   :  { %v219_v44 = vadd.f32 %v1981_v33, %v218_v61 }
 0x112   :  { %v2060_v31 = vpop.f32.mrf.mxu0 }
 0x113   :  { %v932_v35 = vcombine.high %v219_v44, %v219_v44  ;;  %v939_v14 = vrot.slane %v219_v44, %v2425_v6 }
 0x114   :  { %v221_v32 = vpop.f32.mrf.mxu0 }
 0x115   :  { %v946_v36 = vrot.slane %v932_v35, %v2425_v6  ;;  %v947_v38 = vcombine.high %v939_v14, %v939_v14  ;;  %v955_v50 = vrot.slane %v939_v14, %v2425_v6  ;;  %v222_v55 = vadd.f32 %v1981_v33, %v221_v32 }
 0x116   :  { %v2061_v16 = vpop.f32.mrf.mxu0 }
 0x117   :  { %v948_v3 = vcombine.high %v946_v36, %v946_v36  ;;  %v969_v42 = vrot.slane %v947_v38, %v2425_v6  ;;  %v2644_v48 = vrot.slane %v946_v36, %v2425_v6  ;;  %v1033_v62 = vrot.slane %v955_v50, %v2436_v12 }
 0x118   :  { %v988_v9 = vrot.slane %v222_v55, %v2425_v6  ;;  %v977_v26 = vcombine.high %v955_v50, %v955_v50  ;;  %v981_v28 = vcombine.high %v222_v55, %v222_v55 }
 0x119   :  { %v2636_v37 = vrot.slane %v948_v3, %v2425_v6  ;;  %v1037_v54 = vrot.slane %v969_v42, %v2436_v12  ;;  %v978_v58 = vcombine.high %v2644_v48, %v2644_v48  ;;  %v979_v11 = vcombine.high %v969_v42, %v969_v42 }
 0x11a   :  { %v996_v47 = vcombine.high %v988_v9, %v988_v9  ;;  %v1041_v61 = vrot.slane %v977_v26, %v2436_v12  ;;  %v995_v35 = vrot.slane %v981_v28, %v2425_v6 }
 0x11b   :  { %v980_v17 = vcombine.high %v2636_v37, %v2636_v37  ;;  %v1057_v60 = vrot.slane %v978_v58, %v2436_v12  ;;  %v1045_v46 = vrot.slane %v979_v11, %v2436_v12  ;;  %v2343_v58 = vmov 0  }
 0x11c   :  { %v2673_v16 = vrot.slane %v996_v47, %v2425_v6  ;;  %2140 = vset.pattern.permute.xlu1 %v2343_v58  ;;  %2141 = vset.pattern.permute.xlu0 %v2343_v58 }
 0x11d   :  { %v1061_v39 = vrot.slane %v980_v17, %v2436_v12 }
 0x11e   :  { %v1069_v42 = vrot.slane %v2673_v16, %v2436_v12 }
 0x18e   :  { %v2092_v24 = vpop.f32.mrf.mxu1 }
 0x18f   :  { %v1124_v43 = vadd.f32 %v2092_v24, %v1061_v39 }
 0x190   :  { %v851_v45 = vpop.f32.mrf.mxu1 }
 0x191   :  { %v1156_v51 = vmax.f32 %v1124_v43, 0.0  ;;  %v1122_v34 = vadd.f32 %v1057_v60, %v851_v45 }
 0x192   :  { %v2093_v52 = vpop.f32.mrf.mxu1 }
 0x193   :  { %v2080_v57 = vpop.f32.mrf.mxu0  ;;  %v1195_v4 = vmul.f32 %v2649_v49, %v1156_v51  ;;  %v1125_v23 = vadd.f32 %v2093_v52, %v1061_v39  ;;  %v1154_v56 = vmax.f32 %v1122_v34, 0.0  ;;  %v2683_v39 = vrot.slane %v988_v9, %v2425_v6 }
 0x194   :  { %v1112_v59 = vadd.f32 %v2080_v57, %v1037_v54  ;;  %v854_v41 = vpop.f32.mrf.mxu1  ;;  %v997_v52 = vcombine.high %v995_v35, %v995_v35 }
 0x195   :  { %1241 = vadd.xlane.f32.xlu1 %v1195_v4  ;;  %v803_v63 = vpop.f32.mrf.mxu0  ;;  %v1157_v31 = vmax.f32 %v1125_v23, 0.0  ;;  %v1123_v32 = vadd.f32 %v1057_v60, %v854_v41  ;;  %v1193_v38 = vmul.f32 %v2649_v49, %v1154_v56 }
 0x196   :  { %v1144_v1 = vmax.f32 %v1112_v59, 0.0  ;;  %v1110_v2 = vadd.f32 %v1033_v62, %v803_v63  ;;  %v2096_v5 = vpop.f32.mrf.mxu1  ;;  %v1065_v59 = vrot.slane %v2683_v39, %v2436_v12 }
 0x197   :  { %v2081_v10 = vpop.f32.mrf.mxu0  ;;  %v1155_v24 = vmax.f32 %v1123_v32, 0.0  ;;  %v1196_v50 = vmul.f32 %v2649_v49, %v1157_v31 }
 0x198   :  { %v1142_v21 = vmax.f32 %v1110_v2, 0.0  ;;  %v1113_v22 = vadd.f32 %v2081_v10, %v1037_v54  ;;  %v2659_v7 = vpop.f32.mrf.mxu1  ;;  %v1183_v15 = vmul.f32 %v2649_v49, %v1144_v1  ;;  %v1128_v54 = vadd.f32 %v2096_v5, %v1069_v42 }
 0x199   :  { %v806_v8 = vpop.f32.mrf.mxu0  ;;  %v1194_v1 = vmul.f32 %v2649_v49, %v1155_v24  ;;  %v2699_v5 = vrot.slane %v997_v52, %v2425_v6  ;;  %v1126_v10 = vadd.f32 %v1065_v59, %v2659_v7 }
 0x19a   :  { %v1111_v25 = vadd.f32 %v1033_v62, %v806_v8  ;;  %v2662_v18 = vpop.f32.mrf.mxu1  ;;  %1217 = vadd.xlane.f32.xlu0 %v1183_v15  ;;  %v1145_v20 = vmax.f32 %v1113_v22, 0.0  ;;  %v1181_v19 = vmul.f32 %v2649_v49, %v1142_v21  ;;  %v1160_v9 = vmax.f32 %v1128_v54, 0.0 }
 0x19b   :  { %v2084_v13 = vpop.f32.mrf.mxu0  ;;  %v2706_v21 = vrot.slane %v995_v35, %v2425_v6  ;;  %v1129_v22 = vadd.f32 %v2662_v18, %v1069_v42  ;;  %v1053_v8 = vrot.slane %v2636_v37, %v2436_v12  ;;  %v1029_v47 = vcombine.high %v2699_v5, %v2699_v5 }
 0x19c   :  { %v1143_v0 = vmax.f32 %v1111_v25, 0.0  ;;  %v2665_v27 = vpop.f32.mrf.mxu1  ;;  %v1116_v29 = vadd.f32 %v2084_v13, %v1045_v46  ;;  %v1184_v44 = vmul.f32 %v2649_v49, %v1145_v20  ;;  %v1158_v13 = vmax.f32 %v1126_v10, 0.0 }
 0x19d   :  { %v819_v40 = vpop.f32.mrf.mxu0  ;;  %v1199_v6 = vmul.f32 %v2649_v49, %v1160_v9  ;;  %v1049_v18 = vrot.slane %v2644_v48, %v2436_v12  ;;  %v1027_v37 = vcombine.high %v2706_v21, %v2706_v21  ;;  %v1161_v23 = vmax.f32 %v1129_v22, 0.0 }
 0x19e   :  { %v2668_v53 = vpop.f32.mrf.mxu1  ;;  %1213 = vadd.xlane.f32.xlu0 %v1181_v19  ;;  %v1182_v30 = vmul.f32 %v2649_v49, %v1143_v0  ;;  %v1148_v3 = vmax.f32 %v1116_v29, 0.0  ;;  %v1114_v14 = vadd.f32 %v1041_v61, %v819_v40  ;;  %v1127_v20 = vadd.f32 %v1065_v59, %v2665_v27 }
 0x19f   :  { %v2085_v36 = vpop.f32.mrf.mxu0  ;;  %v1028_v0 = vcombine.high %v2673_v16, %v2673_v16  ;;  %v1093_v56 = vrot.slane %v1029_v47, %v2436_v12  ;;  %v1026_v27 = vcombine.high %v2683_v39, %v2683_v39  ;;  %v1089_v31 = vrot.slane %v1027_v37, %v2436_v12 }
 0x1a0   :  { %v2675_v33 = vpop.f32.mrf.mxu1  ;;  %1215 = vadd.xlane.f32.xlu1 %v1182_v30  ;;  %v1117_v43 = vadd.f32 %v2085_v36, %v1045_v46  ;;  %v1146_v55 = vmax.f32 %v1114_v14, 0.0  ;;  %v1187_v4 = vmul.f32 %v2649_v49, %v1148_v3  ;;  %v1159_v16 = vmax.f32 %v1127_v20, 0.0 }
 0x1a1   :  { %v822_v51 = vpop.f32.mrf.mxu0  ;;  %v1200_v3 = vmul.f32 %v2649_v49, %v1161_v23  ;;  %v1073_v52 = vrot.slane %v1026_v27, %v2436_v12 }
 0x1a2   :  { %v2679_v17 = vpop.f32.mrf.mxu1  ;;  %1219 = vadd.xlane.f32.xlu0 %v1184_v44  ;;  %v1149_v41 = vmax.f32 %v1117_v43, 0.0  ;;  %v1115_v62 = vadd.f32 %v1041_v61, %v822_v51  ;;  %v1185_v60 = vmul.f32 %v2649_v49, %v1146_v55  ;;  %v1197_v61 = vmul.f32 %v2649_v49, %v1158_v13 }
 0x1a3   :  { %v2088_v2 = vpop.f32.mrf.mxu0  ;;  %v1077_v44 = vrot.slane %v1028_v0, %v2436_v12  ;;  %v1323_v0 = vpop.permute.xlu0 %1322 }
 0x1a4   :  { %v2687_v45 = vpop.f32.mrf.mxu1  ;;  %1237 = vadd.xlane.f32.xlu1 %v1193_v38  ;;  %v1147_v15 = vmax.f32 %v1115_v62, 0.0  ;;  %v1188_v25 = vmul.f32 %v2649_v49, %v1149_v41  ;;  %v1120_v46 = vadd.f32 %v2088_v2, %v1053_v8  ;;  %v1130_v41 = vadd.f32 %v1073_v52, %v2675_v33 }
 0x1a5   :  { %v835_v7 = vpop.f32.mrf.mxu0  ;;  %v1132_v42 = vadd.f32 %v2668_v53, %v1077_v44  ;;  %v1133_v62 = vadd.f32 %v2679_v17, %v1077_v44  ;;  %v1081_v17 = vrot.slane %v2706_v21, %v2436_v12 }
 0x1a6   :  { %v2690_v57 = vpop.f32.mrf.mxu1  ;;  %1243 = vadd.xlane.f32.xlu0 %v1196_v50  ;;  %v1186_v28 = vmul.f32 %v2649_v49, %v1147_v15  ;;  %v1152_v29 = vmax.f32 %v1120_v46, 0.0  ;;  %v1118_v30 = vadd.f32 %v1049_v18, %v835_v7  ;;  %v1162_v10 = vmax.f32 %v1130_v41, 0.0  ;;  %v2750_v15 = vpop.permute.xlu1 %1318 }
 0x1a7   :  { %v2089_v40 = vpop.f32.mrf.mxu0  ;;  %v1164_v59 = vmax.f32 %v1132_v42, 0.0  ;;  %v1165_v33 = vmax.f32 %v1133_v62, 0.0  ;;  %v2819_v62 = vstv %s2976_s7  ;;  %s2344_s7 = smov [#allocation12]  }
 0x1a8   :  { %v2695_v63 = vpop.f32.mrf.mxu1  ;;  %1225 = vadd.xlane.f32.xlu1 %v1187_v4  ;;  %v1121_v35 = vadd.f32 %v2089_v40, %v1053_v8  ;;  %v1150_v43 = vmax.f32 %v1118_v30, 0.0  ;;  %v1191_v39 = vmul.f32 %v2649_v49, %v1152_v29  ;;  %v1198_v4 = vmul.f32 %v2649_v49, %v1159_v16  ;;  %v2769_v30 = vpop.permute.xlu0 %1340  ;;  %s1967_s11 = sshll.u32 %s2344_s7, 4  ;;  %s1968_s11 = int_to_ptr.vmem [resolvable:$true] %s1967_s11 }
 0x1a9   :  { %v838_v14 = vpop.f32.mrf.mxu0  ;;  %v1203_v22 = vmul.f32 %v2649_v49, %v1164_v59  ;;  %v1131_v8 = vadd.f32 %v1073_v52, %v2687_v45  ;;  %v1134_v7 = vadd.f32 %v1081_v17, %v2695_v63  ;;  %v1204_v46 = vmul.f32 %v2649_v49, %v1165_v33  ;;  %s2303_s12 = scalar_lea.vmem %s1968_s11, 256  ;;  %p2308_p12 = scmp.lt.s32.totalorder %s1968_s11, %s1968_s11 }
 0x1aa   :  { %v2702_v11 = vpop.f32.mrf.mxu1  ;;  %1239 = vadd.xlane.f32.xlu0 %v1194_v1  ;;  %v1153_v54 = vmax.f32 %v1121_v35, 0.0  ;;  %v1119_v55 = vadd.f32 %v1049_v18, %v838_v14  ;;  %v1189_v53 = vmul.f32 %v2649_v49, %v1150_v43  ;;  %v1085_v1 = vrot.slane %v2699_v5, %v2436_v12  ;;  %p2304_p11 = scmp.ne.s32.totalorder %s1968_s11, %s2303_s12  ;;  %p2309_p13 = scmp.lt.s32.totalorder %s2303_s12, %s2303_s12 }
 0x1ab   :  { %v1163_v47 = vmax.f32 %v1131_v8, 0.0  ;;  %v1166_v45 = vmax.f32 %v1134_v7, 0.0 }
 0x1ac   :  { %v2711_v34 = vpop.f32.mrf.mxu1  ;;  %1221 = vadd.xlane.f32.xlu1 %v1185_v60  ;;  %v1151_v2 = vmax.f32 %v1119_v55, 0.0  ;;  %v1192_v9 = vmul.f32 %v2649_v49, %v1153_v54  ;;  %v1136_v60 = vadd.f32 %v2690_v57, %v1085_v1  ;;  %v1201_v57 = vmul.f32 %v2649_v49, %v1162_v10  ;;  %p2310_p0 = por %p2309_p13, %p2308_p12 }
 0x1ad   :  { %v1137_v13 = vadd.f32 %v2702_v11, %v1085_v1  ;;  %v1135_v37 = vadd.f32 %v1081_v17, %v2711_v34  ;;  %v1202_v63 = vmul.f32 %v2649_v49, %v1163_v47  ;;  %v1205_v11 = vmul.f32 %v2649_v49, %v1166_v45 }
 0x1ae   :  { %v2716_v26 = vpop.f32.mrf.mxu1  ;;  %1227 = vadd.xlane.f32.xlu0 %v1188_v25  ;;  %v1190_v5 = vmul.f32 %v2649_v49, %v1151_v2  ;;  %v1168_v25 = vmax.f32 %v1136_v60, 0.0  ;;  %p2311_p1 = pnand %p2310_p0, %p2304_p11 }
 0x1af   :  { %v1140_v18 = vadd.f32 %v2716_v26, %v1093_v56  ;;  %v1169_v21 = vmax.f32 %v1137_v13, 0.0  ;;  %v1167_v40 = vmax.f32 %v1135_v37, 0.0 }
 0x1b0   :  { %v2726_v19 = vpop.f32.mrf.mxu1  ;;  %1249 = vadd.xlane.f32.xlu1 %v1199_v6  ;;  %v1330_v6 = vpop.permute.xlu1 %1329  ;;  %v1207_v12 = vmul.f32 %v2649_v49, %v1168_v25 }
 0x1b1   :  { %v1172_v23 = vmax.f32 %v1140_v18, 0.0  ;;  %v1138_v20 = vadd.f32 %v1089_v31, %v2726_v19  ;;  %v1208_v26 = vmul.f32 %v2649_v49, %v1169_v21  ;;  %v1206_v34 = vmul.f32 %v2649_v49, %v1167_v40 }
 0x1b2   :  { %v2109_v48 = vpop.f32.mrf.mxu1  ;;  %1223 = vadd.xlane.f32.xlu0 %v1186_v28 }
 0x1b3   :  { %v1141_v32 = vadd.f32 %v2109_v48, %v1093_v56  ;;  %v1170_v56 = vmax.f32 %v1138_v20, 0.0  ;;  %v1211_v29 = vmul.f32 %v2649_v49, %v1172_v23 }
 0x1b4   :  { %v918_v36 = vpop.f32.mrf.mxu1  ;;  %1245 = vadd.xlane.f32.xlu1 %v1197_v61  ;;  %v1334_v28 = vpop.permute.xlu1 %1333 }
 0x1b5   :  { %v1173_v38 = vmax.f32 %v1141_v32, 0.0  ;;  %v1139_v24 = vadd.f32 %v1089_v31, %v918_v36  ;;  %v1209_v19 = vmul.f32 %v2649_v49, %v1170_v56  ;;  %v1352_v61 = vpop.permute.xlu0 %1351 }
 0x1b6   :  { %1251 = vadd.xlane.f32.xlu0 %v1200_v3 }
 0x1b7   :  { %v1171_v50 = vmax.f32 %v1139_v24, 0.0  ;;  %v1212_v51 = vmul.f32 %v2649_v49, %v1173_v38 }
 0x1b8   :  { %1233 = vadd.xlane.f32.xlu1 %v1191_v39  ;;  %v2771_v48 = vpop.permute.xlu1 %1344 }
 0x1b9   :  { %v1210_v58 = vmul.f32 %v2649_v49, %v1171_v50  ;;  %v2776_v31 = vpop.permute.xlu0 %1362 }
 0x1ba   :  { %1247 = vadd.xlane.f32.xlu0 %v1198_v4 }
 0x1bc   :  { %1229 = vadd.xlane.f32.xlu1 %v1189_v53  ;;  %v2774_v27 = vpop.permute.xlu1 %1355 }
 0x1bd   :  { %v2780_v16 = vpop.permute.xlu0 %1373 }
 0x1be   :  { %1235 = vadd.xlane.f32.xlu0 %v1192_v9 }
 0x1c0   :  { %1257 = vadd.xlane.f32.xlu1 %v1203_v22  ;;  %v2778_v32 = vpop.permute.xlu1 %1366 }
 0x1c1   :  { %v1385_v35 = vpop.permute.xlu0 %1384 }
 0x1c2   :  { %1231 = vadd.xlane.f32.xlu0 %v1190_v5 }
 0x1c4   :  { %1253 = vadd.xlane.f32.xlu1 %v1201_v57  ;;  %v2782_v44 = vpop.permute.xlu1 %1377 }
 0x1c5   :  { %v1396_v3 = vpop.permute.xlu0 %1395 }
 0x1c6   :  { %1259 = vadd.xlane.f32.xlu0 %v1204_v46 }
 0x1c8   :  { %1265 = vadd.xlane.f32.xlu1 %v1207_v12  ;;  %v1389_v36 = vpop.permute.xlu1 %1388 }
 0x1c9   :  { %v2784_v38 = vpop.permute.xlu0 %1406 }
 0x1ca   :  { %1255 = vadd.xlane.f32.xlu0 %v1202_v63 }
 0x1cc   :  { %1261 = vadd.xlane.f32.xlu1 %v1205_v11  ;;  %v1400_v14 = vpop.permute.xlu1 %1399 }
 0x1cd   :  { %v2788_v24 = vpop.permute.xlu0 %1417 }
 0x1ce   :  { %1267 = vadd.xlane.f32.xlu0 %v1208_v26 }
 0x1d0   :  { %1273 = vadd.xlane.f32.xlu1 %v1211_v29  ;;  %v2786_v49 = vpop.permute.xlu1 %1410 }
 0x1d1   :  { %v2792_v43 = vpop.permute.xlu0 %1428 }
 0x1d2   :  { %1263 = vadd.xlane.f32.xlu0 %v1206_v34 }
 0x1d4   :  { %1269 = vadd.xlane.f32.xlu1 %v1209_v19  ;;  %v2790_v42 = vpop.permute.xlu1 %1421 }
 0x1d5   :  { %v2796_v50 = vpop.permute.xlu0 %1439 }
 0x1d6   :  { %1275 = vadd.xlane.f32.xlu0 %v1212_v51 }
 0x1d8   :  { %v2794_v39 = vpop.permute.xlu1 %1432 }
 0x1d9   :  { %v2800_v52 = vpop.permute.xlu0 %1450 }
 0x1da   :  { %1271 = vadd.xlane.f32.xlu0 %v1210_v58 }
 0x1dc   :  { %v2798_v51 = vpop.permute.xlu1 %1443 }
 0x1dd   :  { %v2804_v55 = vpop.permute.xlu0 %1461 }
 0x1e0   :  { %v2802_v54 = vpop.permute.xlu1 %1454 }
 0x1e1   :  { %v2808_v58 = vpop.permute.xlu0 %1472 }
 0x1e4   :  { %v2806_v4 = vpop.permute.xlu1 %1465 }
 0x1e5   :  { %v2812_v41 = vpop.permute.xlu0 %1483 }
 0x1e8   :  { %v2810_v59 = vpop.permute.xlu1 %1476 }
 0x1ec   :  { %v2814_v53 = vpop.permute.xlu1 %1487 }
 0x21e   :  { %v1242_v1 = vpop.xlane.xlu1 %1241 }
 0x21f   :  { %v1293_v10 = vadd.f32 %v2819_v62, %v1242_v1 }
 0x221   :  { %v1535_v17 = vmul.f32 %v1396_v3, %v1293_v10 }
 0x223   :  { %v1218_v2 = vpop.xlane.xlu0 %1217 }
 0x224   :  { %v1281_v9 = vadd.f32 %v2819_v62, %v1218_v2 }
 0x226   :  { %v1523_v60 = vmul.f32 %v1330_v6, %v1281_v9 }
 0x227   :  { %v1214_v22 = vpop.xlane.xlu0 %1213 }
 0x228   :  { %v1279_v33 = vadd.f32 %v2819_v62, %v1214_v22  ;;  %1597 = vperm.xlu1 %2140, %v1523_v60  }
 0x229   :  { %v1216_v8 = vpop.xlane.xlu1 %1215 }
 0x22a   :  { %v1521_v5 = vmul.f32 %v2750_v15, %v1279_v33  ;;  %v1280_v25 = vadd.f32 %v2819_v62, %v1216_v8 }
 0x22b   :  { %v1220_v7 = vpop.xlane.xlu0 %1219 }
 0x22c   :  { %v1282_v57 = vadd.f32 %v2819_v62, %v1220_v7  ;;  %1657 = vperm.xlu1 %2140, %v1535_v17   ;;  %1587 = vperm.xlu0 %2141, %v1521_v5   ;;  %v1522_v13 = vmul.f32 %v1323_v0, %v1280_v25 }
 0x22d   :  { %v1238_v47 = vpop.xlane.xlu1 %1237 }
 0x22e   :  { %v1524_v46 = vmul.f32 %v1334_v28, %v1282_v57  ;;  %v1291_v6 = vadd.f32 %v2819_v62, %v1238_v47 }
 0x22f   :  { %v1244_v45 = vpop.xlane.xlu0 %1243 }
 0x230   :  { %v1294_v18 = vadd.f32 %v2819_v62, %v1244_v45  ;;  %1592 = vperm.xlu1 %2140, %v1522_v13   ;;  %1602 = vperm.xlu0 %2141, %v1524_v46   ;;  %v1533_v21 = vmul.f32 %v1385_v35, %v1291_v6 }
 0x231   :  { %v1226_v12 = vpop.xlane.xlu1 %1225 }
 0x232   :  { %v1536_v15 = vmul.f32 %v1400_v14, %v1294_v18  ;;  %v1285_v37 = vadd.f32 %v2819_v62, %v1226_v12 }
 0x233   :  { %v1240_v63 = vpop.xlane.xlu0 %1239 }
 0x234   :  { %v1292_v23 = vadd.f32 %v2819_v62, %v1240_v63  ;;  %1647 = vperm.xlu1 %2140, %v1533_v21   ;;  %1662 = vperm.xlu0 %2141, %v1536_v15   ;;  %v1527_v11 = vmul.f32 %v1352_v61, %v1285_v37 }
 0x235   :  { %v1222_v20 = vpop.xlane.xlu1 %1221 }
 0x236   :  { %v1534_v0 = vmul.f32 %v1389_v36, %v1292_v23  ;;  %v1283_v28 = vadd.f32 %v2819_v62, %v1222_v20 }
 0x237   :  { %v1228_v40 = vpop.xlane.xlu0 %1227 }
 0x238   :  { %v1286_v26 = vadd.f32 %v2819_v62, %v1228_v40  ;;  %1617 = vperm.xlu1 %2140, %v1527_v11   ;;  %1652 = vperm.xlu0 %2141, %v1534_v0   ;;  %v1525_v29 = vmul.f32 %v2769_v30, %v1283_v28 }
 0x239   :  { %v1250_v56 = vpop.xlane.xlu1 %1249 }
 0x23a   :  { %v1528_v34 = vmul.f32 %v2774_v27, %v1286_v26  ;;  %v1297_v19 = vadd.f32 %v2819_v62, %v1250_v56 }
 0x23b   :  { %v1224_v35 = vpop.xlane.xlu0 %1223 }
 0x23c   :  { %v1284_v3 = vadd.f32 %v2819_v62, %v1224_v35  ;;  %1607 = vperm.xlu1 %2140, %v1525_v29   ;;  %1622 = vperm.xlu0 %2141, %v1528_v34   ;;  %v1539_v36 = vmul.f32 %v2788_v24, %v1297_v19 }
 0x23d   :  { %v1246_v61 = vpop.xlane.xlu1 %1245 }
 0x23e   :  { %v1526_v14 = vmul.f32 %v2771_v48, %v1284_v3  ;;  %v1295_v1 = vadd.f32 %v2819_v62, %v1246_v61 }
 0x23f   :  { %v1252_v2 = vpop.xlane.xlu0 %1251 }
 0x240   :  { %v1298_v9 = vadd.f32 %v2819_v62, %v1252_v2  ;;  %1677 = vperm.xlu1 %2140, %v1539_v36   ;;  %1612 = vperm.xlu0 %2141, %v1526_v14   ;;  %v1537_v27 = vmul.f32 %v2784_v38, %v1295_v1  ;;  %v2187_v2 = vld [vmem:[#allocation6] sm:$0xff]  }
 0x241   :  { %v1234_v30 = vpop.xlane.xlu1 %1233 }
 0x242   :  { %v1540_v10 = vmul.f32 %v2790_v42, %v1298_v9  ;;  %v1289_v60 = vadd.f32 %v2819_v62, %v1234_v30  ;;  %v1554_v9 = vunpack.c.h.bf16 %v2187_v2  ;;  %v2188_v30 = vld [vmem:[#allocation6 + $0x8] sm:$0xff]  }
 0x243   :  { %v1248_v22 = vpop.xlane.xlu0 %1247 }
 0x244   :  { %v1296_v33 = vadd.f32 %v2819_v62, %v1248_v22  ;;  %1667 = vperm.xlu1 %2140, %v1537_v27   ;;  %1682 = vperm.xlu0 %2141, %v1540_v10   ;;  %v1531_v24 = vmul.f32 %v2780_v16, %v1289_v60  ;;  %v1553_v27 = vunpack.c.l.bf16 %v2187_v2  ;;  %v1555_v10 = vunpack.c.l.bf16 %v2188_v30 }
 0x245   :  { %v1230_v48 = vpop.xlane.xlu1 %1229 }
 0x246   :  { %v1538_v8 = vmul.f32 %v2786_v49, %v1296_v33  ;;  %v1287_v17 = vadd.f32 %v2819_v62, %v1230_v48 }
 0x247   :  { %v1236_v5 = vpop.xlane.xlu0 %1235 }
 0x248   :  { %v1290_v25 = vadd.f32 %v2819_v62, %v1236_v5  ;;  %1637 = vperm.xlu1 %2140, %v1531_v24   ;;  %1672 = vperm.xlu0 %2141, %v1538_v8   ;;  %v1529_v42 = vmul.f32 %v2776_v31, %v1287_v17 }
 0x249   :  { %v1258_v38 = vpop.xlane.xlu1 %1257 }
 0x24a   :  { %v1532_v7 = vmul.f32 %v2782_v44, %v1290_v25  ;;  %v1301_v57 = vadd.f32 %v2819_v62, %v1258_v38  ;;  %v2189_v25 = vld [vmem:[#allocation6 + $0x10] sm:$0xff]  }
 0x24b   :  { %v1232_v47 = vpop.xlane.xlu0 %1231  ;;  %v1557_v38 = vunpack.c.l.bf16 %v2189_v25 }
 0x24c   :  { %v1288_v13 = vadd.f32 %v2819_v62, %v1232_v47  ;;  %1627 = vperm.xlu1 %2140, %v1529_v42   ;;  %1642 = vperm.xlu0 %2141, %v1532_v7   ;;  %v1543_v49 = vmul.f32 %v2796_v50, %v1301_v57  ;;  %v2190_v42 = vld [vmem:[#allocation6 + $0x18] sm:$0xff]  }
 0x24d   :  { %v1254_v16 = vpop.xlane.xlu1 %1253  ;;  %v1560_v7 = vunpack.c.h.bf16 %v2190_v42 }
 0x24e   :  { %v1530_v46 = vmul.f32 %v2778_v32, %v1288_v13  ;;  %v1299_v6 = vadd.f32 %v2819_v62, %v1254_v16  ;;  %v2191_v13 = vld [vmem:[#allocation6 + $0x38] sm:$0xff]  }
 0x24f   :  { %v1260_v45 = vpop.xlane.xlu0 %1259  ;;  %v1568_v16 = vunpack.c.h.bf16 %v2191_v13 }
 0x250   :  { %v1302_v18 = vadd.f32 %v2819_v62, %v1260_v45  ;;  %1697 = vperm.xlu1 %2140, %v1543_v49   ;;  %1632 = vperm.xlu0 %2141, %v1530_v46   ;;  %v1541_v44 = vmul.f32 %v2792_v43, %v1299_v6  ;;  %v1559_v45 = vunpack.c.l.bf16 %v2190_v42 }
 0x251   :  { %v1266_v31 = vpop.xlane.xlu1 %1265 }
 0x252   :  { %v1544_v12 = vmul.f32 %v2798_v51, %v1302_v18  ;;  %v1305_v21 = vadd.f32 %v2819_v62, %v1266_v31  ;;  %v1558_v18 = vunpack.c.h.bf16 %v2189_v25  ;;  %v1567_v31 = vunpack.c.l.bf16 %v2191_v13 }
 0x253   :  { %v1256_v15 = vpop.xlane.xlu0 %1255 }
 0x254   :  { %v1300_v37 = vadd.f32 %v2819_v62, %v1256_v15  ;;  %1687 = vperm.xlu1 %2140, %v1541_v44   ;;  %1702 = vperm.xlu0 %2141, %v1544_v12   ;;  %v1547_v50 = vmul.f32 %v2804_v55, %v1305_v21  ;;  %v2192_v44 = vld [vmem:[#allocation6 + $0x30] sm:$0xff]  }
 0x255   :  { %v1262_v32 = vpop.xlane.xlu1 %1261  ;;  %v1566_v12 = vunpack.c.h.bf16 %v2192_v44 }
 0x256   :  { %v1542_v63 = vmul.f32 %v2794_v39, %v1300_v37  ;;  %v1303_v23 = vadd.f32 %v2819_v62, %v1262_v32  ;;  %v1565_v32 = vunpack.c.l.bf16 %v2192_v44 }
 0x257   :  { %v1268_v20 = vpop.xlane.xlu0 %1267 }
 0x258   :  { %v1306_v11 = vadd.f32 %v2819_v62, %v1268_v20  ;;  %1717 = vperm.xlu1 %2140, %v1547_v50   ;;  %1692 = vperm.xlu0 %2141, %v1542_v63   ;;  %v1545_v51 = vmul.f32 %v2800_v52, %v1303_v23 }
 0x259   :  { %v1274_v43 = vpop.xlane.xlu1 %1273 }
 0x25a   :  { %v1548_v0 = vmul.f32 %v2806_v4, %v1306_v11  ;;  %v1309_v29 = vadd.f32 %v2819_v62, %v1274_v43 }
 0x25b   :  { %v1264_v28 = vpop.xlane.xlu0 %1263 }
 0x25c   :  { %v1304_v40 = vadd.f32 %v2819_v62, %v1264_v28  ;;  %1707 = vperm.xlu1 %2140, %v1545_v51   ;;  %1722 = vperm.xlu0 %2141, %v1548_v0   ;;  %v1551_v4 = vmul.f32 %v2812_v41, %v1309_v29  ;;  %v1556_v41 = vunpack.c.h.bf16 %v2188_v30 }
 0x25d   :  { %v1270_v55 = vpop.xlane.xlu1 %1269 }
 0x25e   :  { %v1546_v39 = vmul.f32 %v2802_v54, %v1304_v40  ;;  %v1307_v26 = vadd.f32 %v2819_v62, %v1270_v55 }
 0x25f   :  { %v1276_v56 = vpop.xlane.xlu0 %1275 }
 0x260   :  { %v1549_v34 = vmul.f32 %v2808_v58, %v1307_v26  ;;  %1712 = vperm.xlu0 %2141, %v1546_v39   ;;  %v1310_v35 = vadd.f32 %v2819_v62, %v1276_v56 }
 0x262   :  { %1727 = vperm.xlu1 %2140, %v1549_v34   ;;  %v1552_v54 = vmul.f32 %v2814_v53, %v1310_v35 }
 0x263   :  { %v1272_v52 = vpop.xlane.xlu0 %1271 }
 0x264   :  { %v1308_v19 = vadd.f32 %v2819_v62, %v1272_v52 }
 0x266   :  { %v1550_v3 = vmul.f32 %v2810_v59, %v1308_v19  ;;  %1737 = vperm.xlu1 %2140, %v1551_v4  }
 0x268   :  { %1732 = vperm.xlu0 %2141, %v1550_v3  }
 0x26c   :  { %1742 = vperm.xlu0 %2141, %v1552_v54  }
 0x2a3   :  { %v1598_v61 = vpop.permute.xlu1 %1597 }
 0x2a4   :  { %v1747_v48 = vmul.f32 %v1598_v61, %v1555_v10 }
 0x2a6   :  { %v1786_v57 = vsel %vm180_vm1, %v1747_v48, 0.0 }
 0x2a7   :  { %v1658_v36 = vpop.permute.xlu1 %1657  ;;  %v1588_v14 = vpop.permute.xlu0 %1587 }
 0x2a8   :  { %v1745_v33 = vmul.f32 %v1588_v14, %v1553_v27  ;;  %v1759_v51 = vmul.f32 %v1658_v36, %v1567_v31  ;;  %v2193_v14 = vld [vmem:[#allocation6 + $0x48] sm:$0xff]   ;;  %v2195_v27 = vld [vmem:[#allocation6 + $0x40] sm:$0xff]  }
 0x2a9   :  { %v1569_v10 = vunpack.c.l.bf16 %v2195_v27 }
 0x2aa   :  { %v1777_v5 = vsel %vm180_vm1, %v1745_v33, 0.0  ;;  %v1840_v35 = vsel %vm180_vm1, %v1759_v51, 0.0  ;;  %v1572_v33 = vunpack.c.h.bf16 %v2193_v14 }
 0x2ab   :  { %v1593_v58 = vpop.permute.xlu1 %1592  ;;  %v1603_v1 = vpop.permute.xlu0 %1602 }
 0x2ac   :  { %v1746_v22 = vmul.f32 %v1593_v58, %v1554_v9  ;;  %v1748_v59 = vmul.f32 %v1603_v1, %v1556_v41  ;;  %v1571_v58 = vunpack.c.l.bf16 %v2193_v14  ;;  %v2194_v1 = vld [vmem:[#allocation6 + $0x28] sm:$0xff]  }
 0x2ad   :  { %v1563_v2 = vunpack.c.l.bf16 %v2194_v1  ;;  %v1564_v48 = vunpack.c.h.bf16 %v2194_v1 }
 0x2ae   :  { %v1778_v8 = vsel %vm180_vm1, %v1746_v22, 0.0  ;;  %v1787_v17 = vsel %vm180_vm1, %v1748_v59, 0.0 }
 0x2af   :  { %v1648_v60 = vpop.permute.xlu1 %1647  ;;  %v1663_v62 = vpop.permute.xlu0 %1662  ;;  %v1779_v47 = vadd.f32 %v1778_v8, %v1777_v5  ;;  %v1788_v6 = vadd.f32 %v1787_v17, %v1786_v57  ;;  %v2196_v8 = vld [vmem:[#allocation6 + $0x20] sm:$0xff]   ;;  %v2893_v5 = vld [vmem:[#allocation6 + $0x58] sm:$0xff]   ;;  %v2896_v57 = vld [vmem:[#allocation6 + $0x50] sm:$0xff]  }
 0x2b0   :  { %v1760_v50 = vmul.f32 %v1663_v62, %v1568_v16  ;;  %v1757_v26 = vmul.f32 %v1648_v60, %v1565_v32  ;;  %v1561_v17 = vunpack.c.l.bf16 %v2196_v8  ;;  %v1575_v25 = vunpack.c.l.bf16 %v2893_v5 }
 0x2b1   :  { %v1780_v37 = vrot.slane %v1779_v47, 4  ;;  %v1789_v20 = vrot.slane %v1788_v6, 4 }
 0x2b2   :  { %v1841_v56 = vsel %vm180_vm1, %v1760_v50, 0.0  ;;  %v1831_v30 = vsel %vm180_vm1, %v1757_v26, 0.0 }
 0x2b3   :  { %v1618_v24 = vpop.permute.xlu1 %1617  ;;  %v1653_v53 = vpop.permute.xlu0 %1652  ;;  %v1781_v39 = vadd.f32 %v1780_v37, %v1779_v47  ;;  %v1790_v4 = vadd.f32 %v1789_v20, %v1788_v6  ;;  %v1842_v36 = vadd.f32 %v1841_v56, %v1840_v35  ;;  %v1573_v47 = vunpack.c.l.bf16 %v2896_v57  ;;  %v2904_v37 = vld [vmem:[#allocation6 + $0x60] sm:$0xff]  }
 0x2b4   :  { %v1751_v11 = vmul.f32 %v1618_v24, %v1559_v45  ;;  %v1758_v0 = vmul.f32 %v1653_v53, %v1566_v12  ;;  %v1570_v53 = vunpack.c.h.bf16 %v2195_v27  ;;  %v1576_v6 = vunpack.c.h.bf16 %v2893_v5  ;;  %v2900_v45 = vld [vmem:[#allocation6 + $0x68] sm:$0xff]  }
 0x2b5   :  { %v1782_v9 = vrot.slane %v1781_v39, 2  ;;  %v1791_v22 = vrot.slane %v1790_v4, 2  ;;  %v1577_v32 = vunpack.c.l.bf16 %v2904_v37  ;;  %v1580_v50 = vunpack.c.h.bf16 %v2900_v45 }
 0x2b6   :  { %v1804_v19 = vsel %vm180_vm1, %v1751_v11, 0.0  ;;  %v1832_v3 = vsel %vm180_vm1, %v1758_v0, 0.0 }
 0x2b7   :  { %v1608_v49 = vpop.permute.xlu1 %1607  ;;  %v1623_v46 = vpop.permute.xlu0 %1622  ;;  %v1833_v59 = vadd.f32 %v1832_v3, %v1831_v30  ;;  %v1783_v13 = vadd.f32 %v1782_v9, %v1781_v39  ;;  %v1792_v31 = vadd.f32 %v1791_v22, %v1790_v4 }
 0x2b8   :  { %v1749_v21 = vmul.f32 %v1608_v49, %v1557_v38  ;;  %v1752_v15 = vmul.f32 %v1623_v46, %v1560_v7  ;;  %v1843_v38 = vrot.slane %v1842_v36, 4  ;;  %v1562_v7 = vunpack.c.h.bf16 %v2196_v8 }
 0x2b9   :  { %v1834_v44 = vrot.slane %v1833_v59, 4  ;;  %v1784_v0 = vrot.slane %v1783_v13, 1  ;;  %v1793_v56 = vrot.slane %v1792_v31, 1 }
 0x2ba   :  { %v1795_v28 = vsel %vm180_vm1, %v1749_v21, 0.0  ;;  %v1805_v40 = vsel %vm180_vm1, %v1752_v15, 0.0  ;;  %v1574_v21 = vunpack.c.h.bf16 %v2896_v57  ;;  %v1844_v20 = vadd.f32 %v1843_v38, %v1842_v36 }
 0x2bb   :  { %v2881_v63 = vpop.permute.xlu1 %1677  ;;  %v1613_v23 = vpop.permute.xlu0 %1612  ;;  %v1806_v54 = vadd.f32 %v1805_v40, %v1804_v19 }
 0x2bc   :  { %v1750_v43 = vmul.f32 %v1613_v23, %v1558_v18  ;;  %v1579_v18 = vunpack.c.l.bf16 %v2900_v45  ;;  %v1578_v23 = vunpack.c.h.bf16 %v2904_v37  ;;  %v1763_v3 = vmul.f32 %v2881_v63, %v1571_v58 }
 0x2bd   :  { %v1807_v24 = vrot.slane %v1806_v54, 4  ;;  %v1845_v14 = vrot.slane %v1844_v20, 2  ;;  %v1785_v63 = vadd.f32 %v1784_v0, %v1783_v13  ;;  %v1794_v58 = vadd.f32 %v1793_v56, %v1792_v31 }
 0x2be   :  { %v1796_v55 = vsel %vm180_vm1, %v1750_v43, 0.0 }
 0x2bf   :  { %v1797_v29 = vadd.f32 %v1796_v55, %v1795_v28  ;;  %v2887_v34 = vpop.permute.xlu1 %1667  ;;  %v1683_v52 = vpop.permute.xlu0 %1682  ;;  %v1808_v15 = vadd.f32 %v1807_v24, %v1806_v54 }
 0x2c0   :  { %v1764_v40 = vmul.f32 %v1683_v52, %v1572_v33  ;;  %v1761_v1 = vmul.f32 %v2887_v34, %v1569_v10  ;;  %v1858_v34 = vsel %vm180_vm1, %v1763_v3, 0.0 }
 0x2c1   :  { %v1798_v61 = vrot.slane %v1797_v29, 4  ;;  %v1809_v35 = vrot.slane %v1808_v15, 2 }
 0x2c2   :  { %v1859_v30 = vsel %vm180_vm1, %v1764_v40, 0.0  ;;  %v1849_v24 = vsel %vm180_vm1, %v1761_v1, 0.0 }
 0x2c3   :  { %v1799_v41 = vadd.f32 %v1798_v61, %v1797_v29  ;;  %v1638_v60 = vpop.permute.xlu1 %1637  ;;  %v1673_v62 = vpop.permute.xlu0 %1672  ;;  %v1835_v29 = vadd.f32 %v1834_v44, %v1833_v59  ;;  %v2912_v61 = vld [vmem:[#allocation6 + $0x70] sm:$0xff]   ;;  %v1810_v33 = vadd.f32 %v1809_v35, %v1808_v15  ;;  %v1938_v44 = vsel %vm1937_vm2, %v1794_v58, %v1785_v63 }
 0x2c4   :  { %v1755_v42 = vmul.f32 %v1638_v60, %v1563_v2  ;;  %v1762_v4 = vmul.f32 %v1673_v62, %v1570_v53  ;;  %v1581_v36 = vunpack.c.l.bf16 %v2912_v61  ;;  %v1860_v53 = vadd.f32 %v1859_v30, %v1858_v34 }
 0x2c5   :  { %v1800_v16 = vrot.slane %v1799_v41, 2  ;;  %v1836_v22 = vrot.slane %v1835_v29, 2  ;;  %v1811_v15 = vrot.slane %v1810_v33, 1  ;;  %v1582_v37 = vunpack.c.h.bf16 %v2912_v61 }
 0x2c6   :  { %v1822_v11 = vsel %vm180_vm1, %v1755_v42, 0.0  ;;  %v1850_v59 = vsel %vm180_vm1, %v1762_v4, 0.0 }
 0x2c7   :  { %v1628_v49 = vpop.permute.xlu1 %1627  ;;  %v1643_v46 = vpop.permute.xlu0 %1642  ;;  %v1801_v28 = vadd.f32 %v1800_v16, %v1799_v41  ;;  %v1851_v42 = vadd.f32 %v1850_v59, %v1849_v24  ;;  %v1846_v16 = vadd.f32 %v1845_v14, %v1844_v20  ;;  %v1812_v56 = vadd.f32 %v1811_v15, %v1810_v33 }
 0x2c8   :  { %v1756_v12 = vmul.f32 %v1643_v46, %v1564_v48  ;;  %v1753_v43 = vmul.f32 %v1628_v49, %v1561_v17 }
 0x2c9   :  { %v1802_v9 = vrot.slane %v1801_v28, 1  ;;  %v1852_v0 = vrot.slane %v1851_v42, 4  ;;  %v1847_v35 = vrot.slane %v1846_v16, 1 }
 0x2ca   :  { %v1823_v51 = vsel %vm180_vm1, %v1756_v12, 0.0  ;;  %v1813_v52 = vsel %vm180_vm1, %v1753_v43, 0.0  ;;  %v1837_v12 = vadd.f32 %v1836_v22, %v1835_v29 }
 0x2cb   :  { %v1824_v55 = vadd.f32 %v1823_v51, %v1822_v11  ;;  %v1698_v39 = vpop.permute.xlu1 %1697  ;;  %v1633_v26 = vpop.permute.xlu0 %1632  ;;  %v1803_v38 = vadd.f32 %v1802_v9, %v1801_v28  ;;  %v1848_v33 = vadd.f32 %v1847_v35, %v1846_v16 }
 0x2cc   :  { %v1754_v19 = vmul.f32 %v1633_v26, %v1562_v7  ;;  %v1767_v46 = vmul.f32 %v1698_v39, %v1575_v25  ;;  %v1838_v3 = vrot.slane %v1837_v12, 1 }
 0x2cd   :  { %v1825_v54 = vrot.slane %v1824_v55, 4  ;;  %v1940_v20 = vsel %vm1939_vm3, %v1803_v38, %v1938_v44 }
 0x2ce   :  { %v1814_v2 = vsel %vm180_vm1, %v1754_v19, 0.0  ;;  %v1839_v63 = vadd.f32 %v1838_v3, %v1837_v12 }
 0x2cf   :  { %v1826_v41 = vadd.f32 %v1825_v54, %v1824_v55  ;;  %v1815_v27 = vadd.f32 %v1814_v2, %v1813_v52  ;;  %v1688_v60 = vpop.permute.xlu1 %1687  ;;  %v1703_v62 = vpop.permute.xlu0 %1702  ;;  %v1876_v55 = vsel %vm180_vm1, %v1767_v46, 0.0  ;;  %v1853_v52 = vadd.f32 %v1852_v0, %v1851_v42 }
 0x2d0   :  { %v1765_v8 = vmul.f32 %v1688_v60, %v1573_v47  ;;  %v1768_v17 = vmul.f32 %v1703_v62, %v1576_v6  ;;  %v1861_v47 = vrot.slane %v1860_v53, 4 }
 0x2d1   :  { %v1827_v10 = vrot.slane %v1826_v41, 2  ;;  %v1816_v48 = vrot.slane %v1815_v27, 4  ;;  %v1854_v34 = vrot.slane %v1853_v52, 2 }
 0x2d2   :  { %v1867_v6 = vsel %vm180_vm1, %v1765_v8, 0.0  ;;  %v1877_v43 = vsel %vm180_vm1, %v1768_v17, 0.0  ;;  %v1862_v1 = vadd.f32 %v1861_v47, %v1860_v53 }
 0x2d3   :  { %v1817_v7 = vadd.f32 %v1816_v48, %v1815_v27  ;;  %v1718_v57 = vpop.permute.xlu1 %1717  ;;  %v1693_v13 = vpop.permute.xlu0 %1692  ;;  %v1828_v49 = vadd.f32 %v1827_v10, %v1826_v41  ;;  %v1878_v4 = vadd.f32 %v1877_v43, %v1876_v55 }
 0x2d4   :  { %v1766_v31 = vmul.f32 %v1693_v13, %v1574_v21  ;;  %v1771_v39 = vmul.f32 %v1718_v57, %v1579_v18  ;;  %v1942_v18 = vsel %vm1941_vm4, %v1812_v56, %v1940_v20  ;;  %v1863_v48 = vrot.slane %v1862_v1, 2 }
 0x2d5   :  { %v1818_v11 = vrot.slane %v1817_v7, 2  ;;  %v1829_v40 = vrot.slane %v1828_v49, 1  ;;  %v1879_v27 = vrot.slane %v1878_v4, 4  ;;  %v1855_v13 = vadd.f32 %v1854_v34, %v1853_v52 }
 0x2d6   :  { %v1868_v51 = vsel %vm180_vm1, %v1766_v31, 0.0  ;;  %v1894_v45 = vsel %vm180_vm1, %v1771_v39, 0.0  ;;  %v1864_v31 = vadd.f32 %v1863_v48, %v1862_v1 }
 0x2d7   :  { %v1819_v28 = vadd.f32 %v1818_v11, %v1817_v7  ;;  %v1869_v5 = vadd.f32 %v1868_v51, %v1867_v6  ;;  %v1708_v25 = vpop.permute.xlu1 %1707  ;;  %v1723_v21 = vpop.permute.xlu0 %1722  ;;  %v1830_v30 = vadd.f32 %v1829_v40, %v1828_v49  ;;  %v1880_v53 = vadd.f32 %v1879_v27, %v1878_v4  ;;  %v2202_v7 = vld [vmem:[#allocation6 + $0x78] sm:$0xff]  }
 0x2d8   :  { %v1772_v26 = vmul.f32 %v1723_v21, %v1580_v50  ;;  %v1769_v54 = vmul.f32 %v1708_v25, %v1577_v32  ;;  %v1583_v57 = vunpack.c.l.bf16 %v2202_v7  ;;  %v1584_v15 = vunpack.c.h.bf16 %v2202_v7 }
 0x2d9   :  { %v1820_v29 = vrot.slane %v1819_v28, 1  ;;  %v1870_v19 = vrot.slane %v1869_v5, 4  ;;  %v1881_v11 = vrot.slane %v1880_v53, 2 }
 0x2da   :  { %v1895_v14 = vsel %vm180_vm1, %v1772_v26, 0.0  ;;  %v1885_v58 = vsel %vm180_vm1, %v1769_v54, 0.0 }
 0x2db   :  { %v1821_v2 = vadd.f32 %v1820_v29, %v1819_v28  ;;  %v1713_v9 = vpop.permute.xlu0 %1712  ;;  %v1871_v50 = vadd.f32 %v1870_v19, %v1869_v5  ;;  %v1896_v60 = vadd.f32 %v1895_v14, %v1894_v45  ;;  %v1865_v28 = vrot.slane %v1864_v31, 1 }
 0x2dc   :  { %v1770_v41 = vmul.f32 %v1713_v9, %v1578_v23  ;;  %v1882_v40 = vadd.f32 %v1881_v11, %v1880_v53 }
 0x2dd   :  { %v1728_v62 = vpop.permute.xlu1 %1727  ;;  %v1944_v32 = vsel %vm1943_vm5, %v1821_v2, %v1942_v18  ;;  %v1872_v24 = vrot.slane %v1871_v50, 2  ;;  %v1897_v8 = vrot.slane %v1896_v60, 4  ;;  %v1866_v35 = vadd.f32 %v1865_v28, %v1864_v31 }
 0x2de   :  { %v1886_v22 = vsel %vm180_vm1, %v1770_v41, 0.0  ;;  %v1946_v59 = vsel %vm1945_vm6, %v1830_v30, %v1944_v32  ;;  %v1773_v42 = vmul.f32 %v1728_v62, %v1581_v36  ;;  %v1856_v36 = vrot.slane %v1855_v13, 1 }
 0x2df   :  { %v1887_v10 = vadd.f32 %v1886_v22, %v1885_v58  ;;  %v1948_v23 = vsel %vm1947_vm7, %v1839_v63, %v1946_v59  ;;  %v1873_v44 = vadd.f32 %v1872_v24, %v1871_v50  ;;  %v1898_v47 = vadd.f32 %v1897_v8, %v1896_v60 }
 0x2e0   :  { %v1950_v38 = vsel %vm1949_vm8, %v1848_v33, %v1948_v23  ;;  %v1903_v43 = vsel %vm180_vm1, %v1773_v42, 0.0  ;;  %v1857_v29 = vadd.f32 %v1856_v36, %v1855_v13  ;;  %v1883_v14 = vrot.slane %v1882_v40, 1 }
 0x2e1   :  { %v1888_v17 = vrot.slane %v1887_v10, 4  ;;  %1960 = vst.msk [vmem:[#allocation12] sm:$0xff] %vm180_vm1, %v1950_v38  ;;  %v1738_v49 = vpop.permute.xlu1 %1737  ;;  %v1874_v5 = vrot.slane %v1873_v44, 1  ;;  %v1899_v55 = vrot.slane %v1898_v47, 2 }
 0x2e2   :  { %v1775_v51 = vmul.f32 %v1738_v49, %v1583_v57  ;;  %v1951_v9 = vsel %vm1937_vm2, %v1866_v35, %v1857_v29  ;;  %v1884_v41 = vadd.f32 %v1883_v14, %v1882_v40 }
 0x2e3   :  { %v1889_v16 = vadd.f32 %v1888_v17, %v1887_v10  ;;  %v1733_v46 = vpop.permute.xlu0 %1732  ;;  %v1875_v3 = vadd.f32 %v1874_v5, %v1873_v44  ;;  %v1900_v1 = vadd.f32 %v1899_v55, %v1898_v47 }
 0x2e4   :  { %v1774_v12 = vmul.f32 %v1733_v46, %v1582_v37  ;;  %v1912_v26 = vsel %vm180_vm1, %v1775_v51, 0.0 }
 0x2e5   :  { %v1890_v6 = vrot.slane %v1889_v16, 2  ;;  %v1952_v45 = vsel %vm1939_vm3, %v1875_v3, %v1951_v9  ;;  %v1901_v27 = vrot.slane %v1900_v1, 1 }
 0x2e6   :  { %v1904_v61 = vsel %vm180_vm1, %v1774_v12, 0.0  ;;  %v1953_v63 = vsel %vm1941_vm4, %v1884_v41, %v1952_v45 }
 0x2e7   :  { %v1905_v20 = vadd.f32 %v1904_v61, %v1903_v43  ;;  %v1743_v0 = vpop.permute.xlu0 %1742  ;;  %v1891_v25 = vadd.f32 %v1890_v6, %v1889_v16  ;;  %v1902_v59 = vadd.f32 %v1901_v27, %v1900_v1 }
 0x2e8   :  { %v1776_v21 = vmul.f32 %v1743_v0, %v1584_v15 }
 0x2e9   :  { %v1906_v39 = vrot.slane %v1905_v20, 4  ;;  %v1892_v54 = vrot.slane %v1891_v25, 1 }
 0x2ea   :  { %v1913_v56 = vsel %vm180_vm1, %v1776_v21, 0.0 }
 0x2eb   :  { %v1907_v4 = vadd.f32 %v1906_v39, %v1905_v20  ;;  %v1914_v19 = vadd.f32 %v1913_v56, %v1912_v26  ;;  %v1893_v50 = vadd.f32 %v1892_v54, %v1891_v25 }
 0x2ed   :  { %v1908_v52 = vrot.slane %v1907_v4, 2  ;;  %v1915_v2 = vrot.slane %v1914_v19, 4  ;;  %v1954_v22 = vsel %vm1943_vm5, %v1893_v50, %v1953_v63 }
 0x2ee   :  { %v1955_v10 = vsel %vm1945_vm6, %v1902_v59, %v1954_v22 }
 0x2ef   :  { %v1909_v18 = vadd.f32 %v1908_v52, %v1907_v4  ;;  %v1916_v30 = vadd.f32 %v1915_v2, %v1914_v19 }
 0x2f1   :  { %v1910_v60 = vrot.slane %v1909_v18, 1  ;;  %v1917_v62 = vrot.slane %v1916_v30, 2 }
 0x2f3   :  { %v1918_v32 = vadd.f32 %v1917_v62, %v1916_v30  ;;  %v1911_v58 = vadd.f32 %v1910_v60, %v1909_v18 }
 0x2f5   :  { %v1919_v33 = vrot.slane %v1918_v32, 1  ;;  %v1956_v48 = vsel %vm1947_vm7, %v1911_v58, %v1955_v10 }
 0x2f7   :  { %v1920_v34 = vadd.f32 %v1919_v33, %v1918_v32 }
 0x2f9   :  { %v1957_v24 = vsel %vm1949_vm8, %v1920_v34, %v1956_v48 }
 0x2fa   :  { %1961 = vst.msk [vmem:[#allocation12 + $0x8] sm:$0xff] %vm180_vm1, %v1957_v24 }
 0x2fb   :  { %2314 = shalt.err (!%p2311_p1)
}
 0x2fc   :  { %1973 = dma.vmem_to_hbm [thread:$0]  %s1968_s11, 256, %s2977_s8, [#allocation5], %s2337_s23, %s2337_s23, %s2338_s24  }
 0x2fd   :  { %2329 = dma.done.wait [#allocation5], 256  }
 0x2fe   :  { %2330 = vsyncadd [#allocation5], 4294967040 }
 0x2ff   :  { %1977 = vsyncpa [#allocation4], 1 }
 0x300   :  { %1978 = vsyncpa [#allocation7], 1 }
 0x301   :  { %1979 = vsyncpa [#allocation10], 1 }
 0x302   :  { %1980 = vsyncpa [#allocation5], 1 }

</bundles_post_ra>
